<compile_context>
chip_gen: v7x
topology: tpu7x:2x2x1
jax: 0.10.0
libtpu: 0.0.40
codegen_flags: <defaults>
</compile_context>

<pallas_src>
import jax
import jax.numpy as jnp
from jax.experimental import pallas as pl
from jax.experimental.pallas import tpu as pltpu


def hann_kernel(
    # inputs
    x_ref, h0_ref, elm_ref,
    wih_ref, whh_ref, welm_ref, dkwt_ref, skw_ref, bias_ref,
    # outputs
    small_ref, ctx_ref,
):
    SB, H = x_ref.shape            # x is (S*B, H), f32
    B = h0_ref.shape[0]
    S = SB // B
    K2 = dkwt_ref.shape[1]         # 2*latentK
    K = skw_ref.shape[1]           # latentK
    f32 = jnp.float32
    bf16 = jnp.bfloat16

    # ---- bias / row-vector slab (one vreg tile) ----
    bias = bias_ref[...]                     # (8, W) f32
    b_x3 = bias[0:1, 0:3 * H]                # b_ih with b_hh[r,z] folded in
    b_hn = bias[0:1, 3 * H:4 * H]            # GRU hidden bias of the n gate
    q_bias = bias[1:2, 0:H]                  # l4b + l3b
    bw_row = bias[2:3, 0:H]                  # linear_beta weight (row)
    dkb = bias[3:4, 0:K2]                    # fc_doubleK bias
    skb = bias[4:5, 0:K]                     # fc_singleK bias
    ow_row = bias[5:6, 0:K]                  # fc_out weight (row)
    bb = bias[6:7, 0:1]                      # linear_beta bias
    ob = bias[6:7, 1:2]                      # fc_out bias

    # ---- elm = item_emb * user_emb projections: ONE fused MXU op ----
    #      [ l4w | dkw_bot ]  ->  q_proj and the elm branch of fc_doubleK.
    elm = elm_ref[...]                                           # (B, H) f32
    elm_proj = jnp.dot(elm.astype(bf16), welm_ref[...],
                       preferred_element_type=f32)               # (B, H+2K)
    q_proj = elm_proj[:, 0:H] + q_bias                           # (B, H)
    elm_dk = elm_proj[:, H:H + K2]                               # (B, 2K)

    # ---- input projections for ALL timesteps (hoisted off the recurrence) ----
    x_proj = jnp.dot(x_ref[...].astype(bf16), wih_ref[...],
                     preferred_element_type=f32) + b_x3          # (S*B, 3H)

    whh = whh_ref[...]             # (H, 4H) bf16 = [whr | whz | whn | l3w]

    # ---- nn.GRU(hidden, hidden, n_layers=1): one fused matmul per step ----
    h = h0_ref[...]                                              # (B, H) f32
    hf = jnp.dot(h.astype(bf16), whh, preferred_element_type=f32)
    hs, scores = [], []
    for t in range(S):                                           # static unroll
        xp = x_proj[t * B:(t + 1) * B, :]                        # (B, 3H)
        r = jax.nn.sigmoid(xp[:, 0:H] + hf[:, 0:H])
        z = jax.nn.sigmoid(xp[:, H:2 * H] + hf[:, H:2 * H])
        n = jnp.tanh(xp[:, 2 * H:3 * H] + r * (hf[:, 2 * H:3 * H] + b_hn))
        h = n + z * (h - n)                                      # (1-z)*n + z*h
        hs.append(h)
        # fused projection of the NEW h: gates for step t+1 AND the attention
        # key (h_t @ l3w) for step t, in one (B,H)@(H,4H) dot.
        hf = jnp.dot(h.astype(bf16), whh, preferred_element_type=f32)
        kp = hf[:, 3 * H:4 * H]                                  # h_t @ l3w
        xatt = jnp.maximum(kp + q_proj, 0.0)                     # relu(l3 + l4)
        # linear_beta (H -> 1) as a VPU lane-reduce instead of an N=1 matmul
        scores.append(jnp.sum(xatt * bw_row, axis=-1, keepdims=True) + bb)

    # ---- softmax over the sequence dim (torch.softmax(..., dim=0)) ----
    m = scores[0]
    for t in range(1, S):
        m = jnp.maximum(m, scores[t])
    es = [jnp.exp(s - m) for s in scores]
    denom = es[0]
    for t in range(1, S):
        denom = denom + es[t]
    inv = pl.reciprocal(denom, approx=True)                      # EUP, not VPU div
    attn = [e * inv for e in es]                                 # S x (B, 1)

    # ---- weighted outputs / context vector / sum over sequence ----
    weighted = [attn[t] * hs[t] for t in range(S)]               # S x (B, H)
    ctx_ref[...] = jnp.concatenate(weighted, axis=0)             # (S*B, H)
    osum = weighted[0]
    for t in range(1, S):
        osum = osum + weighted[t]

    # ---- FC head (nn.Dropout(p=0) is the identity) ----
    # concat([osum, elm], 1) @ dkw  ==  osum @ dkw_top + elm @ dkw_bot
    y = (jnp.dot(osum.astype(bf16), dkwt_ref[...], preferred_element_type=f32)
         + elm_dk + dkb)                                         # (B, 2K)
    y = jnp.dot(y.astype(bf16), skw_ref[...],
                preferred_element_type=f32) + skb                # (B, K)
    # fc_out (K -> 1) as a lane-reduce
    logit = jnp.sum(y * ow_row, axis=-1, keepdims=True) + ob     # (B, 1)
    sig = jax.nn.sigmoid(logit)

    # ---- single packed small output: [sigmoid | attn(B,S) | final hidden] ----
    attn_bs = jnp.concatenate(attn, axis=1)                      # (B, S)
    small_ref[...] = jnp.concatenate([sig, attn_bs, h], axis=1)  # (B, 1+S+H)


def make_params(key, H, K, n_items, n_users):
    def w(k, shape, scale=0.1):
        return (scale * jax.random.normal(k, shape)).astype(jnp.float32)

    ks = jax.random.split(key, 20)
    p = {}
    p["item_emb"] = w(ks[0], (n_items, H), 0.5)
    p["user_emb"] = w(ks[1], (n_users, H), 0.5)

    # GRU weights in PyTorch layout: weight_ih/hh are (3H, H) in [r, z, n] order.
    w_ih = w(ks[2], (3 * H, H))
    w_hh = w(ks[3], (3 * H, H))
    b_ih = w(ks[4], (3 * H,))
    b_hh = w(ks[5], (3 * H,))

    # dualFC attention (weights stored in "x @ W" layout): linear3/4, linear_beta
    l3w = w(ks[6], (H, H))
    l3b = w(ks[7], (H,))
    l4w = w(ks[8], (H, H))
    l4b = w(ks[9], (H,))
    bw = w(ks[10], (H,))
    bb = w(ks[11], (1,))

    # FC head: fc_doubleK (2H -> 2K), fc_singleK (2K -> K), fc_out (K -> 1)
    dkw = w(ks[12], (2 * H, 2 * K))
    dkb = w(ks[13], (2 * K,))
    skw = w(ks[14], (2 * K, K))
    skb = w(ks[15], (K,))
    ow = w(ks[16], (K,))
    ob = w(ks[17], (1,))

    bf16 = jnp.bfloat16
    # Fused, MXU-friendly weights (see kernel):
    #   w_ih  : (H, 3H)   = [wir | wiz | win]        one hoisted matmul for all x_t
    #   w_hh  : (H, 4H)   = [whr | whz | whn | l3w]  one fused matmul per GRU step
    #   w_elm : (H, H+2K) = [l4w | dkw_bot]          one fused matmul on elm
    wir, wiz, win = w_ih[:H].T, w_ih[H:2 * H].T, w_ih[2 * H:].T
    whr, whz, whn = w_hh[:H].T, w_hh[H:2 * H].T, w_hh[2 * H:].T
    p["w_ih"] = jnp.concatenate([wir, wiz, win], axis=1).astype(bf16)
    p["w_hh"] = jnp.concatenate([whr, whz, whn, l3w], axis=1).astype(bf16)
    p["w_elm"] = jnp.concatenate([l4w, dkw[H:]], axis=1).astype(bf16)
    p["dkw_top"] = dkw[:H].astype(bf16)
    p["skw"] = skw.astype(bf16)

    # One (8, W) f32 bias / row-vector slab (single DMA, single vreg tile):
    #   row 0: [b_ih + [b_hh_r, b_hh_z, 0]  (3H) | b_hn (H)]
    #   row 1: l4b + l3b        row 2: linear_beta weight row
    #   row 3: dkb (2K)         row 4: skb (K)
    #   row 5: fc_out weight row (K)
    #   row 6: [linear_beta bias, fc_out bias]
    W = max(4 * H, 2 * K, 128)
    bx3 = b_ih + jnp.concatenate([b_hh[:2 * H], jnp.zeros((H,), jnp.float32)])
    slab = jnp.zeros((8, W), jnp.float32)
    slab = slab.at[0, :4 * H].set(jnp.concatenate([bx3, b_hh[2 * H:]]))
    slab = slab.at[1, :H].set(l4b + l3b)
    slab = slab.at[2, :H].set(bw)
    slab = slab.at[3, :2 * K].set(dkb)
    slab = slab.at[4, :K].set(skb)
    slab = slab.at[5, :K].set(ow)
    slab = slab.at[6, 0].set(bb[0])
    slab = slab.at[6, 1].set(ob[0])
    p["bias_slab"] = slab
    return p


def hann_forward(params, intra_outputs, this_candidate_index, item_index,
                 user_index, hidden=None):
    S, B, H = intra_outputs.shape
    del this_candidate_index  # unused: isCatItemVec=False (default config)

    # embedding gathers + elementwise product: plain-JAX glue
    elm = params["item_emb"][item_index] * params["user_emb"][user_index]  # (B,H)

    if hidden is None:
        h0 = jnp.zeros((B, H), jnp.float32)
    else:
        h0 = hidden.reshape(B, H).astype(jnp.float32)

    # sequence-first (S, B, H) -> flat (S*B, H); kept f32 (free reshape, no
    # extra XLA cast launch) — the bf16 cast for the MXU happens in-kernel.
    x_flat = intra_outputs.reshape(S * B, H)

    out_shapes = (
        jax.ShapeDtypeStruct((B, 1 + S + H), jnp.float32),  # [sig | attn | h_T]
        jax.ShapeDtypeStruct((S * B, H), jnp.float32),      # context vector slab
    )
    vmem = pl.BlockSpec(memory_space=pltpu.MemorySpace.VMEM)
    small, ctx_flat = pl.pallas_call(
        hann_kernel,
        out_shape=out_shapes,
        in_specs=[vmem] * 9,
        out_specs=(vmem, vmem),
    )(
        x_flat, h0, elm,
        params["w_ih"], params["w_hh"], params["w_elm"],
        params["dkw_top"], params["skw"], params["bias_slab"],
    )

    # unpack to torch shapes (free metadata ops / tiny slices in XLA)
    sig = small[:, 0:1]                                   # (B, 1)
    attn = jnp.transpose(small[:, 1:1 + S])[:, :, None]   # (S, B, 1)
    h_last = small[:, 1 + S:1 + S + H]                    # (B, H)
    ctx = ctx_flat.reshape(S, B, H)                       # (S, B, H)

    if B == 1:          # torch .squeeze(0) only removes a size-1 leading dim
        sig = sig[0]
    hidden_out = h_last[None]   # (n_layers=1, B, H)
    return sig, hidden_out, attn, ctx


if __name__ == "__main__":
    H, K = 32, 64          # hidden_size, latentK
    S, B = 8, 2            # seq_len, batch
    n_items, n_users = 10, 12

    key = jax.random.PRNGKey(0)
    k_p, k_x, k_i, k_u, k_c = jax.random.split(key, 5)

    params = make_params(k_p, H, K, n_items, n_users)
    intra_outputs = jax.random.normal(k_x, (S, B, H), dtype=jnp.float32)
    this_candidate_index = jax.random.randint(k_c, (S, B), 0, n_users)
    item_index = jax.random.randint(k_i, (B,), 0, n_items)
    user_index = jax.random.randint(k_u, (B,), 0, n_users)

    sig, hidden, attn, ctx = hann_forward(
        params, intra_outputs, this_candidate_index, item_index, user_index)
    jax.block_until_ready((sig, hidden, attn, ctx))
    print("KERNEL_OK")
</pallas_src>

<mosaic_0001>
module attributes {stable_mosaic.version = 11 : i64} {
  func.func @hann_kernel(%arg0: memref<16x32xf32, #tpu.memory_space<vmem>>, %arg1: memref<2x32xf32, #tpu.memory_space<vmem>>, %arg2: memref<2x32xf32, #tpu.memory_space<vmem>>, %arg3: memref<32x96xbf16, #tpu.memory_space<vmem>>, %arg4: memref<32x128xbf16, #tpu.memory_space<vmem>>, %arg5: memref<32x160xbf16, #tpu.memory_space<vmem>>, %arg6: memref<32x128xbf16, #tpu.memory_space<vmem>>, %arg7: memref<128x64xbf16, #tpu.memory_space<vmem>>, %arg8: memref<8x128xf32, #tpu.memory_space<vmem>>, %arg9: memref<2x41xf32, #tpu.memory_space<vmem>>, %arg10: memref<16x32xf32, #tpu.memory_space<vmem>>) attributes {dimension_semantics = [], scalar_prefetch = 0 : i64, scratch_operands = 0 : i64, tpu.core_type = #tpu.core_type<tc>} {
    %c0 = arith.constant 0 : index
    %c0_0 = arith.constant 0 : index
    %0 = vector.load %arg8[%c0, %c0_0] : memref<8x128xf32, #tpu.memory_space<vmem>>, vector<8x128xf32>
    %1 = vector.extract_strided_slice %0 {offsets = [0, 0], sizes = [1, 96], strides = [1, 1]} : vector<8x128xf32> to vector<1x96xf32>
    %2 = vector.extract_strided_slice %0 {offsets = [0, 96], sizes = [1, 32], strides = [1, 1]} : vector<8x128xf32> to vector<1x32xf32>
    %3 = vector.extract_strided_slice %0 {offsets = [1, 0], sizes = [1, 32], strides = [1, 1]} : vector<8x128xf32> to vector<1x32xf32>
    %4 = vector.extract_strided_slice %0 {offsets = [2, 0], sizes = [1, 32], strides = [1, 1]} : vector<8x128xf32> to vector<1x32xf32>
    %5 = vector.extract_strided_slice %0 {offsets = [3, 0], sizes = [1, 128], strides = [1, 1]} : vector<8x128xf32> to vector<1x128xf32>
    %6 = vector.extract_strided_slice %0 {offsets = [4, 0], sizes = [1, 64], strides = [1, 1]} : vector<8x128xf32> to vector<1x64xf32>
    %7 = vector.extract_strided_slice %0 {offsets = [5, 0], sizes = [1, 64], strides = [1, 1]} : vector<8x128xf32> to vector<1x64xf32>
    %8 = vector.extract_strided_slice %0 {offsets = [6, 0], sizes = [1, 1], strides = [1, 1]} : vector<8x128xf32> to vector<1x1xf32>
    %9 = vector.extract_strided_slice %0 {offsets = [6, 1], sizes = [1, 1], strides = [1, 1]} : vector<8x128xf32> to vector<1x1xf32>
    %c0_1 = arith.constant 0 : index
    %c0_2 = arith.constant 0 : index
    %10 = vector.load %arg2[%c0_1, %c0_2] : memref<2x32xf32, #tpu.memory_space<vmem>>, vector<2x32xf32>
    %11 = arith.truncf %10 : vector<2x32xf32> to vector<2x32xbf16>
    %c0_3 = arith.constant 0 : index
    %c0_4 = arith.constant 0 : index
    %12 = vector.load %arg5[%c0_3, %c0_4] : memref<32x160xbf16, #tpu.memory_space<vmem>>, vector<32x160xbf16>
    %cst = arith.constant dense<0.000000e+00> : vector<2x160xf32>
    %13 = tpu.matmul %11, %12, %cst {dimension_numbers = #tpu.dot_dimension_numbers<[1], [0], [0], [1], [0, 0, 1, 1], [], []>} : vector<2x32xbf16>, vector<32x160xbf16>, vector<2x160xf32> -> vector<2x160xf32>
    %14 = vector.extract_strided_slice %13 {offsets = [0, 0], sizes = [2, 32], strides = [1, 1]} : vector<2x160xf32> to vector<2x32xf32>
    %15 = vector.broadcast %3 : vector<1x32xf32> to vector<2x32xf32>
    %16 = arith.addf %14, %15 : vector<2x32xf32>
    %17 = vector.extract_strided_slice %13 {offsets = [0, 32], sizes = [2, 128], strides = [1, 1]} : vector<2x160xf32> to vector<2x128xf32>
    %c0_5 = arith.constant 0 : index
    %c0_6 = arith.constant 0 : index
    %18 = vector.load %arg0[%c0_5, %c0_6] : memref<16x32xf32, #tpu.memory_space<vmem>>, vector<16x32xf32>
    %19 = arith.truncf %18 : vector<16x32xf32> to vector<16x32xbf16>
    %c0_7 = arith.constant 0 : index
    %c0_8 = arith.constant 0 : index
    %20 = vector.load %arg3[%c0_7, %c0_8] : memref<32x96xbf16, #tpu.memory_space<vmem>>, vector<32x96xbf16>
    %cst_9 = arith.constant dense<0.000000e+00> : vector<16x96xf32>
    %21 = tpu.matmul %19, %20, %cst_9 {dimension_numbers = #tpu.dot_dimension_numbers<[1], [0], [0], [1], [0, 0, 1, 1], [], []>} : vector<16x32xbf16>, vector<32x96xbf16>, vector<16x96xf32> -> vector<16x96xf32>
    %22 = vector.broadcast %1 : vector<1x96xf32> to vector<16x96xf32>
    %23 = arith.addf %21, %22 : vector<16x96xf32>
    %c0_10 = arith.constant 0 : index
    %c0_11 = arith.constant 0 : index
    %24 = vector.load %arg4[%c0_10, %c0_11] : memref<32x128xbf16, #tpu.memory_space<vmem>>, vector<32x128xbf16>
    %c0_12 = arith.constant 0 : index
    %c0_13 = arith.constant 0 : index
    %25 = vector.load %arg1[%c0_12, %c0_13] : memref<2x32xf32, #tpu.memory_space<vmem>>, vector<2x32xf32>
    %26 = arith.truncf %25 : vector<2x32xf32> to vector<2x32xbf16>
    %cst_14 = arith.constant dense<0.000000e+00> : vector<2x128xf32>
    %27 = tpu.matmul %26, %24, %cst_14 {dimension_numbers = #tpu.dot_dimension_numbers<[1], [0], [0], [1], [0, 0, 1, 1], [], []>} : vector<2x32xbf16>, vector<32x128xbf16>, vector<2x128xf32> -> vector<2x128xf32>
    %28 = vector.extract_strided_slice %23 {offsets = [0, 0], sizes = [2, 96], strides = [1, 1]} : vector<16x96xf32> to vector<2x96xf32>
    %29 = vector.extract_strided_slice %28 {offsets = [0, 0], sizes = [2, 32], strides = [1, 1]} : vector<2x96xf32> to vector<2x32xf32>
    %30 = vector.extract_strided_slice %27 {offsets = [0, 0], sizes = [2, 32], strides = [1, 1]} : vector<2x128xf32> to vector<2x32xf32>
    %31 = arith.addf %29, %30 : vector<2x32xf32>
    %32 = arith.negf %31 : vector<2x32xf32>
    %33 = math.exp %32 : vector<2x32xf32>
    %cst_15 = arith.constant 1.000000e+00 : f32
    %34 = vector.broadcast %cst_15 : f32 to vector<2x32xf32>
    %35 = arith.addf %34, %33 : vector<2x32xf32>
    %36 = arith.divf %34, %35 : vector<2x32xf32>
    %37 = vector.extract_strided_slice %28 {offsets = [0, 32], sizes = [2, 32], strides = [1, 1]} : vector<2x96xf32> to vector<2x32xf32>
    %38 = vector.extract_strided_slice %27 {offsets = [0, 32], sizes = [2, 32], strides = [1, 1]} : vector<2x128xf32> to vector<2x32xf32>
    %39 = arith.addf %37, %38 : vector<2x32xf32>
    %40 = arith.negf %39 : vector<2x32xf32>
    %41 = math.exp %40 : vector<2x32xf32>
    %cst_16 = arith.constant 1.000000e+00 : f32
    %42 = vector.broadcast %cst_16 : f32 to vector<2x32xf32>
    %43 = arith.addf %42, %41 : vector<2x32xf32>
    %44 = arith.divf %42, %43 : vector<2x32xf32>
    %45 = vector.extract_strided_slice %28 {offsets = [0, 64], sizes = [2, 32], strides = [1, 1]} : vector<2x96xf32> to vector<2x32xf32>
    %46 = vector.extract_strided_slice %27 {offsets = [0, 64], sizes = [2, 32], strides = [1, 1]} : vector<2x128xf32> to vector<2x32xf32>
    %47 = vector.broadcast %2 : vector<1x32xf32> to vector<2x32xf32>
    %48 = arith.addf %46, %47 : vector<2x32xf32>
    %49 = arith.mulf %36, %48 : vector<2x32xf32>
    %50 = arith.addf %45, %49 : vector<2x32xf32>
    %51 = math.tanh %50 : vector<2x32xf32>
    %52 = arith.subf %25, %51 : vector<2x32xf32>
    %53 = arith.mulf %44, %52 : vector<2x32xf32>
    %54 = arith.addf %51, %53 : vector<2x32xf32>
    %55 = arith.truncf %54 : vector<2x32xf32> to vector<2x32xbf16>
    %cst_17 = arith.constant dense<0.000000e+00> : vector<2x128xf32>
    %56 = tpu.matmul %55, %24, %cst_17 {dimension_numbers = #tpu.dot_dimension_numbers<[1], [0], [0], [1], [0, 0, 1, 1], [], []>} : vector<2x32xbf16>, vector<32x128xbf16>, vector<2x128xf32> -> vector<2x128xf32>
    %57 = vector.extract_strided_slice %56 {offsets = [0, 96], sizes = [2, 32], strides = [1, 1]} : vector<2x128xf32> to vector<2x32xf32>
    %58 = arith.addf %57, %16 : vector<2x32xf32>
    %cst_18 = arith.constant 0.000000e+00 : f32
    %59 = vector.broadcast %cst_18 : f32 to vector<2x32xf32>
    %60 = arith.maximumf %58, %59 : vector<2x32xf32>
    %61 = vector.broadcast %4 : vector<1x32xf32> to vector<2x32xf32>
    %62 = arith.mulf %60, %61 : vector<2x32xf32>
    %cst_19 = arith.constant dense<0.000000e+00> : vector<2xf32>
    %63 = vector.multi_reduction <add>, %62, %cst_19 [1] : vector<2x32xf32> to vector<2xf32>
    %64 = vector.shape_cast %63 : vector<2xf32> to vector<2x1xf32>
    %65 = vector.broadcast %8 : vector<1x1xf32> to vector<2x1xf32>
    %66 = arith.addf %64, %65 : vector<2x1xf32>
    %67 = vector.extract_strided_slice %23 {offsets = [2, 0], sizes = [2, 96], strides = [1, 1]} : vector<16x96xf32> to vector<2x96xf32>
    %68 = vector.extract_strided_slice %67 {offsets = [0, 0], sizes = [2, 32], strides = [1, 1]} : vector<2x96xf32> to vector<2x32xf32>
    %69 = vector.extract_strided_slice %56 {offsets = [0, 0], sizes = [2, 32], strides = [1, 1]} : vector<2x128xf32> to vector<2x32xf32>
    %70 = arith.addf %68, %69 : vector<2x32xf32>
    %71 = arith.negf %70 : vector<2x32xf32>
    %72 = math.exp %71 : vector<2x32xf32>
    %cst_20 = arith.constant 1.000000e+00 : f32
    %73 = vector.broadcast %cst_20 : f32 to vector<2x32xf32>
    %74 = arith.addf %73, %72 : vector<2x32xf32>
    %75 = arith.divf %73, %74 : vector<2x32xf32>
    %76 = vector.extract_strided_slice %67 {offsets = [0, 32], sizes = [2, 32], strides = [1, 1]} : vector<2x96xf32> to vector<2x32xf32>
    %77 = vector.extract_strided_slice %56 {offsets = [0, 32], sizes = [2, 32], strides = [1, 1]} : vector<2x128xf32> to vector<2x32xf32>
    %78 = arith.addf %76, %77 : vector<2x32xf32>
    %79 = arith.negf %78 : vector<2x32xf32>
    %80 = math.exp %79 : vector<2x32xf32>
    %cst_21 = arith.constant 1.000000e+00 : f32
    %81 = vector.broadcast %cst_21 : f32 to vector<2x32xf32>
    %82 = arith.addf %81, %80 : vector<2x32xf32>
    %83 = arith.divf %81, %82 : vector<2x32xf32>
    %84 = vector.extract_strided_slice %67 {offsets = [0, 64], sizes = [2, 32], strides = [1, 1]} : vector<2x96xf32> to vector<2x32xf32>
    %85 = vector.extract_strided_slice %56 {offsets = [0, 64], sizes = [2, 32], strides = [1, 1]} : vector<2x128xf32> to vector<2x32xf32>
    %86 = vector.broadcast %2 : vector<1x32xf32> to vector<2x32xf32>
    %87 = arith.addf %85, %86 : vector<2x32xf32>
    %88 = arith.mulf %75, %87 : vector<2x32xf32>
    %89 = arith.addf %84, %88 : vector<2x32xf32>
    %90 = math.tanh %89 : vector<2x32xf32>
    %91 = arith.subf %54, %90 : vector<2x32xf32>
    %92 = arith.mulf %83, %91 : vector<2x32xf32>
    %93 = arith.addf %90, %92 : vector<2x32xf32>
    %94 = arith.truncf %93 : vector<2x32xf32> to vector<2x32xbf16>
    %cst_22 = arith.constant dense<0.000000e+00> : vector<2x128xf32>
    %95 = tpu.matmul %94, %24, %cst_22 {dimension_numbers = #tpu.dot_dimension_numbers<[1], [0], [0], [1], [0, 0, 1, 1], [], []>} : vector<2x32xbf16>, vector<32x128xbf16>, vector<2x128xf32> -> vector<2x128xf32>
    %96 = vector.extract_strided_slice %95 {offsets = [0, 96], sizes = [2, 32], strides = [1, 1]} : vector<2x128xf32> to vector<2x32xf32>
    %97 = arith.addf %96, %16 : vector<2x32xf32>
    %cst_23 = arith.constant 0.000000e+00 : f32
    %98 = vector.broadcast %cst_23 : f32 to vector<2x32xf32>
    %99 = arith.maximumf %97, %98 : vector<2x32xf32>
    %100 = vector.broadcast %4 : vector<1x32xf32> to vector<2x32xf32>
    %101 = arith.mulf %99, %100 : vector<2x32xf32>
    %cst_24 = arith.constant dense<0.000000e+00> : vector<2xf32>
    %102 = vector.multi_reduction <add>, %101, %cst_24 [1] : vector<2x32xf32> to vector<2xf32>
    %103 = vector.shape_cast %102 : vector<2xf32> to vector<2x1xf32>
    %104 = vector.broadcast %8 : vector<1x1xf32> to vector<2x1xf32>
    %105 = arith.addf %103, %104 : vector<2x1xf32>
    %106 = vector.extract_strided_slice %23 {offsets = [4, 0], sizes = [2, 96], strides = [1, 1]} : vector<16x96xf32> to vector<2x96xf32>
    %107 = vector.extract_strided_slice %106 {offsets = [0, 0], sizes = [2, 32], strides = [1, 1]} : vector<2x96xf32> to vector<2x32xf32>
    %108 = vector.extract_strided_slice %95 {offsets = [0, 0], sizes = [2, 32], strides = [1, 1]} : vector<2x128xf32> to vector<2x32xf32>
    %109 = arith.addf %107, %108 : vector<2x32xf32>
    %110 = arith.negf %109 : vector<2x32xf32>
    %111 = math.exp %110 : vector<2x32xf32>
    %cst_25 = arith.constant 1.000000e+00 : f32
    %112 = vector.broadcast %cst_25 : f32 to vector<2x32xf32>
    %113 = arith.addf %112, %111 : vector<2x32xf32>
    %114 = arith.divf %112, %113 : vector<2x32xf32>
    %115 = vector.extract_strided_slice %106 {offsets = [0, 32], sizes = [2, 32], strides = [1, 1]} : vector<2x96xf32> to vector<2x32xf32>
    %116 = vector.extract_strided_slice %95 {offsets = [0, 32], sizes = [2, 32], strides = [1, 1]} : vector<2x128xf32> to vector<2x32xf32>
    %117 = arith.addf %115, %116 : vector<2x32xf32>
    %118 = arith.negf %117 : vector<2x32xf32>
    %119 = math.exp %118 : vector<2x32xf32>
    %cst_26 = arith.constant 1.000000e+00 : f32
    %120 = vector.broadcast %cst_26 : f32 to vector<2x32xf32>
    %121 = arith.addf %120, %119 : vector<2x32xf32>
    %122 = arith.divf %120, %121 : vector<2x32xf32>
    %123 = vector.extract_strided_slice %106 {offsets = [0, 64], sizes = [2, 32], strides = [1, 1]} : vector<2x96xf32> to vector<2x32xf32>
    %124 = vector.extract_strided_slice %95 {offsets = [0, 64], sizes = [2, 32], strides = [1, 1]} : vector<2x128xf32> to vector<2x32xf32>
    %125 = vector.broadcast %2 : vector<1x32xf32> to vector<2x32xf32>
    %126 = arith.addf %124, %125 : vector<2x32xf32>
    %127 = arith.mulf %114, %126 : vector<2x32xf32>
    %128 = arith.addf %123, %127 : vector<2x32xf32>
    %129 = math.tanh %128 : vector<2x32xf32>
    %130 = arith.subf %93, %129 : vector<2x32xf32>
    %131 = arith.mulf %122, %130 : vector<2x32xf32>
    %132 = arith.addf %129, %131 : vector<2x32xf32>
    %133 = arith.truncf %132 : vector<2x32xf32> to vector<2x32xbf16>
    %cst_27 = arith.constant dense<0.000000e+00> : vector<2x128xf32>
    %134 = tpu.matmul %133, %24, %cst_27 {dimension_numbers = #tpu.dot_dimension_numbers<[1], [0], [0], [1], [0, 0, 1, 1], [], []>} : vector<2x32xbf16>, vector<32x128xbf16>, vector<2x128xf32> -> vector<2x128xf32>
    %135 = vector.extract_strided_slice %134 {offsets = [0, 96], sizes = [2, 32], strides = [1, 1]} : vector<2x128xf32> to vector<2x32xf32>
    %136 = arith.addf %135, %16 : vector<2x32xf32>
    %cst_28 = arith.constant 0.000000e+00 : f32
    %137 = vector.broadcast %cst_28 : f32 to vector<2x32xf32>
    %138 = arith.maximumf %136, %137 : vector<2x32xf32>
    %139 = vector.broadcast %4 : vector<1x32xf32> to vector<2x32xf32>
    %140 = arith.mulf %138, %139 : vector<2x32xf32>
    %cst_29 = arith.constant dense<0.000000e+00> : vector<2xf32>
    %141 = vector.multi_reduction <add>, %140, %cst_29 [1] : vector<2x32xf32> to vector<2xf32>
    %142 = vector.shape_cast %141 : vector<2xf32> to vector<2x1xf32>
    %143 = vector.broadcast %8 : vector<1x1xf32> to vector<2x1xf32>
    %144 = arith.addf %142, %143 : vector<2x1xf32>
    %145 = vector.extract_strided_slice %23 {offsets = [6, 0], sizes = [2, 96], strides = [1, 1]} : vector<16x96xf32> to vector<2x96xf32>
    %146 = vector.extract_strided_slice %145 {offsets = [0, 0], sizes = [2, 32], strides = [1, 1]} : vector<2x96xf32> to vector<2x32xf32>
    %147 = vector.extract_strided_slice %134 {offsets = [0, 0], sizes = [2, 32], strides = [1, 1]} : vector<2x128xf32> to vector<2x32xf32>
    %148 = arith.addf %146, %147 : vector<2x32xf32>
    %149 = arith.negf %148 : vector<2x32xf32>
    %150 = math.exp %149 : vector<2x32xf32>
    %cst_30 = arith.constant 1.000000e+00 : f32
    %151 = vector.broadcast %cst_30 : f32 to vector<2x32xf32>
    %152 = arith.addf %151, %150 : vector<2x32xf32>
    %153 = arith.divf %151, %152 : vector<2x32xf32>
    %154 = vector.extract_strided_slice %145 {offsets = [0, 32], sizes = [2, 32], strides = [1, 1]} : vector<2x96xf32> to vector<2x32xf32>
    %155 = vector.extract_strided_slice %134 {offsets = [0, 32], sizes = [2, 32], strides = [1, 1]} : vector<2x128xf32> to vector<2x32xf32>
    %156 = arith.addf %154, %155 : vector<2x32xf32>
    %157 = arith.negf %156 : vector<2x32xf32>
    %158 = math.exp %157 : vector<2x32xf32>
    %cst_31 = arith.constant 1.000000e+00 : f32
    %159 = vector.broadcast %cst_31 : f32 to vector<2x32xf32>
    %160 = arith.addf %159, %158 : vector<2x32xf32>
    %161 = arith.divf %159, %160 : vector<2x32xf32>
    %162 = vector.extract_strided_slice %145 {offsets = [0, 64], sizes = [2, 32], strides = [1, 1]} : vector<2x96xf32> to vector<2x32xf32>
    %163 = vector.extract_strided_slice %134 {offsets = [0, 64], sizes = [2, 32], strides = [1, 1]} : vector<2x128xf32> to vector<2x32xf32>
    %164 = vector.broadcast %2 : vector<1x32xf32> to vector<2x32xf32>
    %165 = arith.addf %163, %164 : vector<2x32xf32>
    %166 = arith.mulf %153, %165 : vector<2x32xf32>
    %167 = arith.addf %162, %166 : vector<2x32xf32>
    %168 = math.tanh %167 : vector<2x32xf32>
    %169 = arith.subf %132, %168 : vector<2x32xf32>
    %170 = arith.mulf %161, %169 : vector<2x32xf32>
    %171 = arith.addf %168, %170 : vector<2x32xf32>
    %172 = arith.truncf %171 : vector<2x32xf32> to vector<2x32xbf16>
    %cst_32 = arith.constant dense<0.000000e+00> : vector<2x128xf32>
    %173 = tpu.matmul %172, %24, %cst_32 {dimension_numbers = #tpu.dot_dimension_numbers<[1], [0], [0], [1], [0, 0, 1, 1], [], []>} : vector<2x32xbf16>, vector<32x128xbf16>, vector<2x128xf32> -> vector<2x128xf32>
    %174 = vector.extract_strided_slice %173 {offsets = [0, 96], sizes = [2, 32], strides = [1, 1]} : vector<2x128xf32> to vector<2x32xf32>
    %175 = arith.addf %174, %16 : vector<2x32xf32>
    %cst_33 = arith.constant 0.000000e+00 : f32
    %176 = vector.broadcast %cst_33 : f32 to vector<2x32xf32>
    %177 = arith.maximumf %175, %176 : vector<2x32xf32>
    %178 = vector.broadcast %4 : vector<1x32xf32> to vector<2x32xf32>
    %179 = arith.mulf %177, %178 : vector<2x32xf32>
    %cst_34 = arith.constant dense<0.000000e+00> : vector<2xf32>
    %180 = vector.multi_reduction <add>, %179, %cst_34 [1] : vector<2x32xf32> to vector<2xf32>
    %181 = vector.shape_cast %180 : vector<2xf32> to vector<2x1xf32>
    %182 = vector.broadcast %8 : vector<1x1xf32> to vector<2x1xf32>
    %183 = arith.addf %181, %182 : vector<2x1xf32>
    %184 = vector.extract_strided_slice %23 {offsets = [8, 0], sizes = [2, 96], strides = [1, 1]} : vector<16x96xf32> to vector<2x96xf32>
    %185 = vector.extract_strided_slice %184 {offsets = [0, 0], sizes = [2, 32], strides = [1, 1]} : vector<2x96xf32> to vector<2x32xf32>
    %186 = vector.extract_strided_slice %173 {offsets = [0, 0], sizes = [2, 32], strides = [1, 1]} : vector<2x128xf32> to vector<2x32xf32>
    %187 = arith.addf %185, %186 : vector<2x32xf32>
    %188 = arith.negf %187 : vector<2x32xf32>
    %189 = math.exp %188 : vector<2x32xf32>
    %cst_35 = arith.constant 1.000000e+00 : f32
    %190 = vector.broadcast %cst_35 : f32 to vector<2x32xf32>
    %191 = arith.addf %190, %189 : vector<2x32xf32>
    %192 = arith.divf %190, %191 : vector<2x32xf32>
    %193 = vector.extract_strided_slice %184 {offsets = [0, 32], sizes = [2, 32], strides = [1, 1]} : vector<2x96xf32> to vector<2x32xf32>
    %194 = vector.extract_strided_slice %173 {offsets = [0, 32], sizes = [2, 32], strides = [1, 1]} : vector<2x128xf32> to vector<2x32xf32>
    %195 = arith.addf %193, %194 : vector<2x32xf32>
    %196 = arith.negf %195 : vector<2x32xf32>
    %197 = math.exp %196 : vector<2x32xf32>
    %cst_36 = arith.constant 1.000000e+00 : f32
    %198 = vector.broadcast %cst_36 : f32 to vector<2x32xf32>
    %199 = arith.addf %198, %197 : vector<2x32xf32>
    %200 = arith.divf %198, %199 : vector<2x32xf32>
    %201 = vector.extract_strided_slice %184 {offsets = [0, 64], sizes = [2, 32], strides = [1, 1]} : vector<2x96xf32> to vector<2x32xf32>
    %202 = vector.extract_strided_slice %173 {offsets = [0, 64], sizes = [2, 32], strides = [1, 1]} : vector<2x128xf32> to vector<2x32xf32>
    %203 = vector.broadcast %2 : vector<1x32xf32> to vector<2x32xf32>
    %204 = arith.addf %202, %203 : vector<2x32xf32>
    %205 = arith.mulf %192, %204 : vector<2x32xf32>
    %206 = arith.addf %201, %205 : vector<2x32xf32>
    %207 = math.tanh %206 : vector<2x32xf32>
    %208 = arith.subf %171, %207 : vector<2x32xf32>
    %209 = arith.mulf %200, %208 : vector<2x32xf32>
    %210 = arith.addf %207, %209 : vector<2x32xf32>
    %211 = arith.truncf %210 : vector<2x32xf32> to vector<2x32xbf16>
    %cst_37 = arith.constant dense<0.000000e+00> : vector<2x128xf32>
    %212 = tpu.matmul %211, %24, %cst_37 {dimension_numbers = #tpu.dot_dimension_numbers<[1], [0], [0], [1], [0, 0, 1, 1], [], []>} : vector<2x32xbf16>, vector<32x128xbf16>, vector<2x128xf32> -> vector<2x128xf32>
    %213 = vector.extract_strided_slice %212 {offsets = [0, 96], sizes = [2, 32], strides = [1, 1]} : vector<2x128xf32> to vector<2x32xf32>
    %214 = arith.addf %213, %16 : vector<2x32xf32>
    %cst_38 = arith.constant 0.000000e+00 : f32
    %215 = vector.broadcast %cst_38 : f32 to vector<2x32xf32>
    %216 = arith.maximumf %214, %215 : vector<2x32xf32>
    %217 = vector.broadcast %4 : vector<1x32xf32> to vector<2x32xf32>
    %218 = arith.mulf %216, %217 : vector<2x32xf32>
    %cst_39 = arith.constant dense<0.000000e+00> : vector<2xf32>
    %219 = vector.multi_reduction <add>, %218, %cst_39 [1] : vector<2x32xf32> to vector<2xf32>
    %220 = vector.shape_cast %219 : vector<2xf32> to vector<2x1xf32>
    %221 = vector.broadcast %8 : vector<1x1xf32> to vector<2x1xf32>
    %222 = arith.addf %220, %221 : vector<2x1xf32>
    %223 = vector.extract_strided_slice %23 {offsets = [10, 0], sizes = [2, 96], strides = [1, 1]} : vector<16x96xf32> to vector<2x96xf32>
    %224 = vector.extract_strided_slice %223 {offsets = [0, 0], sizes = [2, 32], strides = [1, 1]} : vector<2x96xf32> to vector<2x32xf32>
    %225 = vector.extract_strided_slice %212 {offsets = [0, 0], sizes = [2, 32], strides = [1, 1]} : vector<2x128xf32> to vector<2x32xf32>
    %226 = arith.addf %224, %225 : vector<2x32xf32>
    %227 = arith.negf %226 : vector<2x32xf32>
    %228 = math.exp %227 : vector<2x32xf32>
    %cst_40 = arith.constant 1.000000e+00 : f32
    %229 = vector.broadcast %cst_40 : f32 to vector<2x32xf32>
    %230 = arith.addf %229, %228 : vector<2x32xf32>
    %231 = arith.divf %229, %230 : vector<2x32xf32>
    %232 = vector.extract_strided_slice %223 {offsets = [0, 32], sizes = [2, 32], strides = [1, 1]} : vector<2x96xf32> to vector<2x32xf32>
    %233 = vector.extract_strided_slice %212 {offsets = [0, 32], sizes = [2, 32], strides = [1, 1]} : vector<2x128xf32> to vector<2x32xf32>
    %234 = arith.addf %232, %233 : vector<2x32xf32>
    %235 = arith.negf %234 : vector<2x32xf32>
    %236 = math.exp %235 : vector<2x32xf32>
    %cst_41 = arith.constant 1.000000e+00 : f32
    %237 = vector.broadcast %cst_41 : f32 to vector<2x32xf32>
    %238 = arith.addf %237, %236 : vector<2x32xf32>
    %239 = arith.divf %237, %238 : vector<2x32xf32>
    %240 = vector.extract_strided_slice %223 {offsets = [0, 64], sizes = [2, 32], strides = [1, 1]} : vector<2x96xf32> to vector<2x32xf32>
    %241 = vector.extract_strided_slice %212 {offsets = [0, 64], sizes = [2, 32], strides = [1, 1]} : vector<2x128xf32> to vector<2x32xf32>
    %242 = vector.broadcast %2 : vector<1x32xf32> to vector<2x32xf32>
    %243 = arith.addf %241, %242 : vector<2x32xf32>
    %244 = arith.mulf %231, %243 : vector<2x32xf32>
    %245 = arith.addf %240, %244 : vector<2x32xf32>
    %246 = math.tanh %245 : vector<2x32xf32>
    %247 = arith.subf %210, %246 : vector<2x32xf32>
    %248 = arith.mulf %239, %247 : vector<2x32xf32>
    %249 = arith.addf %246, %248 : vector<2x32xf32>
    %250 = arith.truncf %249 : vector<2x32xf32> to vector<2x32xbf16>
    %cst_42 = arith.constant dense<0.000000e+00> : vector<2x128xf32>
    %251 = tpu.matmul %250, %24, %cst_42 {dimension_numbers = #tpu.dot_dimension_numbers<[1], [0], [0], [1], [0, 0, 1, 1], [], []>} : vector<2x32xbf16>, vector<32x128xbf16>, vector<2x128xf32> -> vector<2x128xf32>
    %252 = vector.extract_strided_slice %251 {offsets = [0, 96], sizes = [2, 32], strides = [1, 1]} : vector<2x128xf32> to vector<2x32xf32>
    %253 = arith.addf %252, %16 : vector<2x32xf32>
    %cst_43 = arith.constant 0.000000e+00 : f32
    %254 = vector.broadcast %cst_43 : f32 to vector<2x32xf32>
    %255 = arith.maximumf %253, %254 : vector<2x32xf32>
    %256 = vector.broadcast %4 : vector<1x32xf32> to vector<2x32xf32>
    %257 = arith.mulf %255, %256 : vector<2x32xf32>
    %cst_44 = arith.constant dense<0.000000e+00> : vector<2xf32>
    %258 = vector.multi_reduction <add>, %257, %cst_44 [1] : vector<2x32xf32> to vector<2xf32>
    %259 = vector.shape_cast %258 : vector<2xf32> to vector<2x1xf32>
    %260 = vector.broadcast %8 : vector<1x1xf32> to vector<2x1xf32>
    %261 = arith.addf %259, %260 : vector<2x1xf32>
    %262 = vector.extract_strided_slice %23 {offsets = [12, 0], sizes = [2, 96], strides = [1, 1]} : vector<16x96xf32> to vector<2x96xf32>
    %263 = vector.extract_strided_slice %262 {offsets = [0, 0], sizes = [2, 32], strides = [1, 1]} : vector<2x96xf32> to vector<2x32xf32>
    %264 = vector.extract_strided_slice %251 {offsets = [0, 0], sizes = [2, 32], strides = [1, 1]} : vector<2x128xf32> to vector<2x32xf32>
    %265 = arith.addf %263, %264 : vector<2x32xf32>
    %266 = arith.negf %265 : vector<2x32xf32>
    %267 = math.exp %266 : vector<2x32xf32>
    %cst_45 = arith.constant 1.000000e+00 : f32
    %268 = vector.broadcast %cst_45 : f32 to vector<2x32xf32>
    %269 = arith.addf %268, %267 : vector<2x32xf32>
    %270 = arith.divf %268, %269 : vector<2x32xf32>
    %271 = vector.extract_strided_slice %262 {offsets = [0, 32], sizes = [2, 32], strides = [1, 1]} : vector<2x96xf32> to vector<2x32xf32>
    %272 = vector.extract_strided_slice %251 {offsets = [0, 32], sizes = [2, 32], strides = [1, 1]} : vector<2x128xf32> to vector<2x32xf32>
    %273 = arith.addf %271, %272 : vector<2x32xf32>
    %274 = arith.negf %273 : vector<2x32xf32>
    %275 = math.exp %274 : vector<2x32xf32>
    %cst_46 = arith.constant 1.000000e+00 : f32
    %276 = vector.broadcast %cst_46 : f32 to vector<2x32xf32>
    %277 = arith.addf %276, %275 : vector<2x32xf32>
    %278 = arith.divf %276, %277 : vector<2x32xf32>
    %279 = vector.extract_strided_slice %262 {offsets = [0, 64], sizes = [2, 32], strides = [1, 1]} : vector<2x96xf32> to vector<2x32xf32>
    %280 = vector.extract_strided_slice %251 {offsets = [0, 64], sizes = [2, 32], strides = [1, 1]} : vector<2x128xf32> to vector<2x32xf32>
    %281 = vector.broadcast %2 : vector<1x32xf32> to vector<2x32xf32>
    %282 = arith.addf %280, %281 : vector<2x32xf32>
    %283 = arith.mulf %270, %282 : vector<2x32xf32>
    %284 = arith.addf %279, %283 : vector<2x32xf32>
    %285 = math.tanh %284 : vector<2x32xf32>
    %286 = arith.subf %249, %285 : vector<2x32xf32>
    %287 = arith.mulf %278, %286 : vector<2x32xf32>
    %288 = arith.addf %285, %287 : vector<2x32xf32>
    %289 = arith.truncf %288 : vector<2x32xf32> to vector<2x32xbf16>
    %cst_47 = arith.constant dense<0.000000e+00> : vector<2x128xf32>
    %290 = tpu.matmul %289, %24, %cst_47 {dimension_numbers = #tpu.dot_dimension_numbers<[1], [0], [0], [1], [0, 0, 1, 1], [], []>} : vector<2x32xbf16>, vector<32x128xbf16>, vector<2x128xf32> -> vector<2x128xf32>
    %291 = vector.extract_strided_slice %290 {offsets = [0, 96], sizes = [2, 32], strides = [1, 1]} : vector<2x128xf32> to vector<2x32xf32>
    %292 = arith.addf %291, %16 : vector<2x32xf32>
    %cst_48 = arith.constant 0.000000e+00 : f32
    %293 = vector.broadcast %cst_48 : f32 to vector<2x32xf32>
    %294 = arith.maximumf %292, %293 : vector<2x32xf32>
    %295 = vector.broadcast %4 : vector<1x32xf32> to vector<2x32xf32>
    %296 = arith.mulf %294, %295 : vector<2x32xf32>
    %cst_49 = arith.constant dense<0.000000e+00> : vector<2xf32>
    %297 = vector.multi_reduction <add>, %296, %cst_49 [1] : vector<2x32xf32> to vector<2xf32>
    %298 = vector.shape_cast %297 : vector<2xf32> to vector<2x1xf32>
    %299 = vector.broadcast %8 : vector<1x1xf32> to vector<2x1xf32>
    %300 = arith.addf %298, %299 : vector<2x1xf32>
    %301 = vector.extract_strided_slice %23 {offsets = [14, 0], sizes = [2, 96], strides = [1, 1]} : vector<16x96xf32> to vector<2x96xf32>
    %302 = vector.extract_strided_slice %301 {offsets = [0, 0], sizes = [2, 32], strides = [1, 1]} : vector<2x96xf32> to vector<2x32xf32>
    %303 = vector.extract_strided_slice %290 {offsets = [0, 0], sizes = [2, 32], strides = [1, 1]} : vector<2x128xf32> to vector<2x32xf32>
    %304 = arith.addf %302, %303 : vector<2x32xf32>
    %305 = arith.negf %304 : vector<2x32xf32>
    %306 = math.exp %305 : vector<2x32xf32>
    %cst_50 = arith.constant 1.000000e+00 : f32
    %307 = vector.broadcast %cst_50 : f32 to vector<2x32xf32>
    %308 = arith.addf %307, %306 : vector<2x32xf32>
    %309 = arith.divf %307, %308 : vector<2x32xf32>
    %310 = vector.extract_strided_slice %301 {offsets = [0, 32], sizes = [2, 32], strides = [1, 1]} : vector<2x96xf32> to vector<2x32xf32>
    %311 = vector.extract_strided_slice %290 {offsets = [0, 32], sizes = [2, 32], strides = [1, 1]} : vector<2x128xf32> to vector<2x32xf32>
    %312 = arith.addf %310, %311 : vector<2x32xf32>
    %313 = arith.negf %312 : vector<2x32xf32>
    %314 = math.exp %313 : vector<2x32xf32>
    %cst_51 = arith.constant 1.000000e+00 : f32
    %315 = vector.broadcast %cst_51 : f32 to vector<2x32xf32>
    %316 = arith.addf %315, %314 : vector<2x32xf32>
    %317 = arith.divf %315, %316 : vector<2x32xf32>
    %318 = vector.extract_strided_slice %301 {offsets = [0, 64], sizes = [2, 32], strides = [1, 1]} : vector<2x96xf32> to vector<2x32xf32>
    %319 = vector.extract_strided_slice %290 {offsets = [0, 64], sizes = [2, 32], strides = [1, 1]} : vector<2x128xf32> to vector<2x32xf32>
    %320 = vector.broadcast %2 : vector<1x32xf32> to vector<2x32xf32>
    %321 = arith.addf %319, %320 : vector<2x32xf32>
    %322 = arith.mulf %309, %321 : vector<2x32xf32>
    %323 = arith.addf %318, %322 : vector<2x32xf32>
    %324 = math.tanh %323 : vector<2x32xf32>
    %325 = arith.subf %288, %324 : vector<2x32xf32>
    %326 = arith.mulf %317, %325 : vector<2x32xf32>
    %327 = arith.addf %324, %326 : vector<2x32xf32>
    %328 = arith.truncf %327 : vector<2x32xf32> to vector<2x32xbf16>
    %cst_52 = arith.constant dense<0.000000e+00> : vector<2x128xf32>
    %329 = tpu.matmul %328, %24, %cst_52 {dimension_numbers = #tpu.dot_dimension_numbers<[1], [0], [0], [1], [0, 0, 1, 1], [], []>} : vector<2x32xbf16>, vector<32x128xbf16>, vector<2x128xf32> -> vector<2x128xf32>
    %330 = vector.extract_strided_slice %329 {offsets = [0, 96], sizes = [2, 32], strides = [1, 1]} : vector<2x128xf32> to vector<2x32xf32>
    %331 = arith.addf %330, %16 : vector<2x32xf32>
    %cst_53 = arith.constant 0.000000e+00 : f32
    %332 = vector.broadcast %cst_53 : f32 to vector<2x32xf32>
    %333 = arith.maximumf %331, %332 : vector<2x32xf32>
    %334 = vector.broadcast %4 : vector<1x32xf32> to vector<2x32xf32>
    %335 = arith.mulf %333, %334 : vector<2x32xf32>
    %cst_54 = arith.constant dense<0.000000e+00> : vector<2xf32>
    %336 = vector.multi_reduction <add>, %335, %cst_54 [1] : vector<2x32xf32> to vector<2xf32>
    %337 = vector.shape_cast %336 : vector<2xf32> to vector<2x1xf32>
    %338 = vector.broadcast %8 : vector<1x1xf32> to vector<2x1xf32>
    %339 = arith.addf %337, %338 : vector<2x1xf32>
    %340 = arith.maximumf %66, %105 : vector<2x1xf32>
    %341 = arith.maximumf %340, %144 : vector<2x1xf32>
    %342 = arith.maximumf %341, %183 : vector<2x1xf32>
    %343 = arith.maximumf %342, %222 : vector<2x1xf32>
    %344 = arith.maximumf %343, %261 : vector<2x1xf32>
    %345 = arith.maximumf %344, %300 : vector<2x1xf32>
    %346 = arith.maximumf %345, %339 : vector<2x1xf32>
    %347 = arith.subf %66, %346 : vector<2x1xf32>
    %348 = math.exp %347 : vector<2x1xf32>
    %349 = arith.subf %105, %346 : vector<2x1xf32>
    %350 = math.exp %349 : vector<2x1xf32>
    %351 = arith.subf %144, %346 : vector<2x1xf32>
    %352 = math.exp %351 : vector<2x1xf32>
    %353 = arith.subf %183, %346 : vector<2x1xf32>
    %354 = math.exp %353 : vector<2x1xf32>
    %355 = arith.subf %222, %346 : vector<2x1xf32>
    %356 = math.exp %355 : vector<2x1xf32>
    %357 = arith.subf %261, %346 : vector<2x1xf32>
    %358 = math.exp %357 : vector<2x1xf32>
    %359 = arith.subf %300, %346 : vector<2x1xf32>
    %360 = math.exp %359 : vector<2x1xf32>
    %361 = arith.subf %339, %346 : vector<2x1xf32>
    %362 = math.exp %361 : vector<2x1xf32>
    %363 = arith.addf %348, %350 : vector<2x1xf32>
    %364 = arith.addf %363, %352 : vector<2x1xf32>
    %365 = arith.addf %364, %354 : vector<2x1xf32>
    %366 = arith.addf %365, %356 : vector<2x1xf32>
    %367 = arith.addf %366, %358 : vector<2x1xf32>
    %368 = arith.addf %367, %360 : vector<2x1xf32>
    %369 = arith.addf %368, %362 : vector<2x1xf32>
    %370 = tpu.reciprocal %369 {approx = true} : vector<2x1xf32> -> vector<2x1xf32>
    %371 = arith.mulf %348, %370 : vector<2x1xf32>
    %372 = arith.mulf %350, %370 : vector<2x1xf32>
    %373 = arith.mulf %352, %370 : vector<2x1xf32>
    %374 = arith.mulf %354, %370 : vector<2x1xf32>
    %375 = arith.mulf %356, %370 : vector<2x1xf32>
    %376 = arith.mulf %358, %370 : vector<2x1xf32>
    %377 = arith.mulf %360, %370 : vector<2x1xf32>
    %378 = arith.mulf %362, %370 : vector<2x1xf32>
    %379 = vector.broadcast %371 : vector<2x1xf32> to vector<2x32xf32>
    %380 = arith.mulf %379, %54 : vector<2x32xf32>
    %381 = vector.broadcast %372 : vector<2x1xf32> to vector<2x32xf32>
    %382 = arith.mulf %381, %93 : vector<2x32xf32>
    %383 = vector.broadcast %373 : vector<2x1xf32> to vector<2x32xf32>
    %384 = arith.mulf %383, %132 : vector<2x32xf32>
    %385 = vector.broadcast %374 : vector<2x1xf32> to vector<2x32xf32>
    %386 = arith.mulf %385, %171 : vector<2x32xf32>
    %387 = vector.broadcast %375 : vector<2x1xf32> to vector<2x32xf32>
    %388 = arith.mulf %387, %210 : vector<2x32xf32>
    %389 = vector.broadcast %376 : vector<2x1xf32> to vector<2x32xf32>
    %390 = arith.mulf %389, %249 : vector<2x32xf32>
    %391 = vector.broadcast %377 : vector<2x1xf32> to vector<2x32xf32>
    %392 = arith.mulf %391, %288 : vector<2x32xf32>
    %393 = vector.broadcast %378 : vector<2x1xf32> to vector<2x32xf32>
    %394 = arith.mulf %393, %327 : vector<2x32xf32>
    %395 = tpu.concatenate %380, %382, %384, %386, %388, %390, %392, %394 in 0 : vector<2x32xf32>, vector<2x32xf32>, vector<2x32xf32>, vector<2x32xf32>, vector<2x32xf32>, vector<2x32xf32>, vector<2x32xf32>, vector<2x32xf32> -> vector<16x32xf32>
    %c0_55 = arith.constant 0 : index
    %c0_56 = arith.constant 0 : index
    %396 = vector.load %arg10[%c0_55, %c0_56] : memref<16x32xf32, #tpu.memory_space<vmem>>, vector<16x32xf32>
    tpu.vector_store %arg10[%c0_55, %c0_56], %395 {strides = array<i32>} : memref<16x32xf32, #tpu.memory_space<vmem>>, vector<16x32xf32>,
    %397 = arith.addf %380, %382 : vector<2x32xf32>
    %398 = arith.addf %397, %384 : vector<2x32xf32>
    %399 = arith.addf %398, %386 : vector<2x32xf32>
    %400 = arith.addf %399, %388 : vector<2x32xf32>
    %401 = arith.addf %400, %390 : vector<2x32xf32>
    %402 = arith.addf %401, %392 : vector<2x32xf32>
    %403 = arith.addf %402, %394 : vector<2x32xf32>
    %404 = arith.truncf %403 : vector<2x32xf32> to vector<2x32xbf16>
    %c0_57 = arith.constant 0 : index
    %c0_58 = arith.constant 0 : index
    %405 = vector.load %arg6[%c0_57, %c0_58] : memref<32x128xbf16, #tpu.memory_space<vmem>>, vector<32x128xbf16>
    %cst_59 = arith.constant dense<0.000000e+00> : vector<2x128xf32>
    %406 = tpu.matmul %404, %405, %cst_59 {dimension_numbers = #tpu.dot_dimension_numbers<[1], [0], [0], [1], [0, 0, 1, 1], [], []>} : vector<2x32xbf16>, vector<32x128xbf16>, vector<2x128xf32> -> vector<2x128xf32>
    %407 = arith.addf %406, %17 : vector<2x128xf32>
    %408 = vector.broadcast %5 : vector<1x128xf32> to vector<2x128xf32>
    %409 = arith.addf %407, %408 : vector<2x128xf32>
    %410 = arith.truncf %409 : vector<2x128xf32> to vector<2x128xbf16>
    %c0_60 = arith.constant 0 : index
    %c0_61 = arith.constant 0 : index
    %411 = vector.load %arg7[%c0_60, %c0_61] : memref<128x64xbf16, #tpu.memory_space<vmem>>, vector<128x64xbf16>
    %cst_62 = arith.constant dense<0.000000e+00> : vector<2x64xf32>
    %412 = tpu.matmul %410, %411, %cst_62 {dimension_numbers = #tpu.dot_dimension_numbers<[1], [0], [0], [1], [0, 0, 1, 1], [], []>} : vector<2x128xbf16>, vector<128x64xbf16>, vector<2x64xf32> -> vector<2x64xf32>
    %413 = vector.broadcast %6 : vector<1x64xf32> to vector<2x64xf32>
    %414 = arith.addf %412, %413 : vector<2x64xf32>
    %415 = vector.broadcast %7 : vector<1x64xf32> to vector<2x64xf32>
    %416 = arith.mulf %414, %415 : vector<2x64xf32>
    %cst_63 = arith.constant dense<0.000000e+00> : vector<2xf32>
    %417 = vector.multi_reduction <add>, %416, %cst_63 [1] : vector<2x64xf32> to vector<2xf32>
    %418 = vector.shape_cast %417 : vector<2xf32> to vector<2x1xf32>
    %419 = vector.broadcast %9 : vector<1x1xf32> to vector<2x1xf32>
    %420 = arith.addf %418, %419 : vector<2x1xf32>
    %421 = arith.negf %420 : vector<2x1xf32>
    %422 = math.exp %421 : vector<2x1xf32>
    %cst_64 = arith.constant 1.000000e+00 : f32
    %423 = vector.broadcast %cst_64 : f32 to vector<2x1xf32>
    %424 = arith.addf %423, %422 : vector<2x1xf32>
    %425 = arith.divf %423, %424 : vector<2x1xf32>
    %426 = tpu.concatenate %371, %372, %373, %374, %375, %376, %377, %378 in 1 : vector<2x1xf32>, vector<2x1xf32>, vector<2x1xf32>, vector<2x1xf32>, vector<2x1xf32>, vector<2x1xf32>, vector<2x1xf32>, vector<2x1xf32> -> vector<2x8xf32>
    %427 = tpu.concatenate %425, %426, %327 in 1 : vector<2x1xf32>, vector<2x8xf32>, vector<2x32xf32> -> vector<2x41xf32>
    %c0_65 = arith.constant 0 : index
    %c0_66 = arith.constant 0 : index
    %428 = vector.load %arg9[%c0_65, %c0_66] : memref<2x41xf32, #tpu.memory_space<vmem>>, vector<2x41xf32>
    tpu.vector_store %arg9[%c0_65, %c0_66], %427 {strides = array<i32>} : memref<2x41xf32, #tpu.memory_space<vmem>>, vector<2x41xf32>,
    return
  }
}

</mosaic_0001>

<bundles_post_ra>
// kernel: tpu_custom_call.1
= control target key start
LH: loop header
LB: loop body
LE: loop exit
PB: predicated region body
PF: predicated region fallthrough
CT: control target
= control target key end

     0   :  { %16 = vsyncpa [#allocation3], 0  ;;  %s2453_s0 = inlined_call_operand.vmem [shape: f32[16,32], index: 0, kind: input, shape index: {}]   ;;  %s2454_s1 = inlined_call_operand.vmem [shape: f32[2,32], index: 1, kind: input, shape index: {}]   ;;  %s2455_s2 = inlined_call_operand.hbm [shape: f32[2,32], index: 2, kind: input, shape index: {}]   ;;  %s2456_s3 = inlined_call_operand.vmem [shape: bf16[32,96], index: 3, kind: input, shape index: {}]   ;;  %s2457_s4 = inlined_call_operand.vmem [shape: bf16[32,128], index: 4, kind: input, shape index: {}]   ;;  %s2458_s5 = inlined_call_operand.vmem [shape: bf16[32,160], index: 5, kind: input, shape index: {}]   ;;  %s2459_s6 = inlined_call_operand.vmem [shape: bf16[32,128], index: 6, kind: input, shape index: {}]   ;;  %s2460_s7 = inlined_call_operand.vmem [shape: bf16[128,64], index: 7, kind: input, shape index: {}]   ;;  %s2461_s8 = inlined_call_operand.vmem [shape: f32[8,128], index: 8, kind: input, shape index: {}]   ;;  %s2462_s9 = inlined_call_operand.hbm [shape: f32[2,41], index: 9, kind: output, shape index: {0}]   ;;  %s2463_s10 = inlined_call_operand.hbm [shape: f32[16,32], index: 10, kind: output, shape index: {1}]  }
   0x1   :  { %17 = vsyncpa [#allocation4], 0 }
   0x2   :  { %18 = vsyncpa [#allocation7], 0  ;;  %s1898_s13 = smov [#allocation2]   ;;  %s1826_s17 = scalar_lea.hbm %s2455_s2, 32 }
   0x3   :  { %s29_s14 = sshll.u32 %s1898_s13, 4  ;;  %p1827_p0 = scmp.ne.s32.totalorder %s2455_s2, %s1826_s17  ;;  %s30_s14 = int_to_ptr.vmem [resolvable:$true] %s29_s14 }
   0x4   :  { %p1830_p1 = scmp.lt.u32.totalorder %s1826_s17, %s2455_s2 }
   0x6   :  { %p1832_p2 = pnand %p1830_p1, %p1827_p0 }
   0x8   :  { %1835 = shalt.err (!%p1832_p2)
}
   0x9   :  { %s1836_s22 = scalar_lea.vmem %s30_s14, 32  ;;  %p1841_p4 = scmp.lt.s32.totalorder %s30_s14, %s30_s14 }
   0xa   :  { %p1837_p3 = scmp.ne.s32.totalorder %s30_s14, %s1836_s22  ;;  %p1842_p5 = scmp.lt.s32.totalorder %s1836_s22, %s1836_s22 }
   0xc   :  { %p1843_p6 = por %p1842_p5, %p1841_p4 }
   0xe   :  { %p1844_p7 = pnand %p1843_p6, %p1837_p3 }
  0x10   :  { %1847 = shalt.err (!%p1844_p7)
}
  0x11   :  { %32 = dma.hbm_to_vmem [thread:$0]  %s2455_s2, 32, %s30_s14, [#allocation3]  }
  0x12   :  { %1892 = dma.done.wait [#allocation3], 32  }
  0x13   :  { %1893 = vsyncadd [#allocation3], 4294967264  ;;  %v1899_v0 = vmov 0   ;;  %v1900_v1 = vmov 0.0   ;;  %vm1901_vm0 = vmmov 0   ;;  %v121_v2 = vlaneseq  ;;  %v2006_v11 = vld [vmem:[%s2457_s4] sm:$0xff]  }
  0x14   :  { %112 = vmatprep.mubr.bf16.mxu1 %v1899_v0  ;;  %1629 = vmatprep.subr.bf16.mxu0 %v1900_v1  ;;  %v1735_v3 = vld [vmem:[%s2458_s5 + $0x4] ss:$8 sps:$4 sm:$0xff]   ;;  %v1737_v4 = vld [vmem:[%s2458_s5] ss:$8 sps:$4 sm:$0xff]   ;;  %v1738_v6 = vld [vmem:[%s2458_s5 + $0x14] ss:$8 sps:$4 sm:$0xff]  }
  0x15   :  { %1633 = vmatprep.mubr.msk.bf16.mxu0 %vm1901_vm0, %v1900_v1  ;;  %1734 = vset.pattern.permute.xlu0 %v1899_v0  ;;  %v1994_v5 = vshrl.u32 %v121_v2, 7  ;;  %v1740_v7 = vld [vmem:[%s2458_s5 + $0x10] ss:$8 sps:$4 sm:$0xff]   ;;  %v50_v8 = vld [vmem:[#allocation2] sm:$0x3]  ;;  %vm76_vm1 = vcmask 261120  }
  0x16   :  { %1733 = vset.pattern.permute.xlu1 %v1899_v0  ;;  %80 = vmatprep.subr.bf16.mxu1 %v1735_v3  ;;  %v51_v10 = vpack.c.bf16 %v50_v8, %v50_v8  ;;  %v1741_v12 = vld [vmem:[%s2456_s3] sm:$0xff]   ;;  %v1742_v14 = vld [vmem:[%s2456_s3 + $0x8] sm:$0xff]   ;;  %s1902_s3 = smov 96   ;;  %s1904_s25 = smov 32   ;;  %vm358_vm2 = vcmask 254976   ;;  %vm1196_vm3 = vcmask 1041408  }
  0x17   :  { %81 = vmatpush1.bf16.msra.mxu1 %v1737_v4  ;;  %v135_v9 = vsub.s32 0, %v1994_v5  ;;  %v2015_v13 = vld [vmem:[%s2461_s8] sm:$0xff]  ;;  %1630 = vmatpush3.bf16.msra.mxu0 %v2006_v11  ;;  %v127_v16 = vld [vmem:[%s2453_s0 + $0x8] sm:$0xff]  ;;  %vm1198_vm4 = vcmask 1043456   ;;  %vm1200_vm5 = vcmask 1045504   ;;  %s1906_s29 = smov 2  }
  0x18   :  { %82 = vmatprep.subr.bf16.mxu1 %v1738_v6  ;;  %v126_v15 = vld [vmem:[%s2453_s0] sm:$0xff]  ;;  %v2030_v17 = vld [vmem:[%s2457_s4 + $0x8] sm:$0xff]   ;;  %1631 = vmatprep.subr.bf16.mxu0 %v1900_v1  ;;  %s1907_s30 = smov 3   ;;  %s1908_s13 = smov 4   ;;  %vm1266_vm6 = vcmask 785408   ;;  %vm1431_vm7 = vcmask 517120  }
  0x19   :  { %v2033_v18 = vrot.slane %v2015_v13, %v135_v9  ;;  %v128_v19 = vpack.c.bf16 %v127_v16, %v126_v15  ;;  %v197_v20 = vld [vmem:[%s2454_s1] sm:$0x3]  ;;  %s1903_s1 = smov 64   ;;  %s1909_s5 = smov 5   ;;  %vm1463_vm8 = vcmask 7168   ;;  %vm1465_vm9 = vcmask 15360  }
  0x1a   :  { %v198_v21 = vpack.c.bf16 %v197_v20, %v197_v20  ;;  %s1910_s18 = smov 6   ;;  %s1911_s21 = smov 7   ;;  %vm1467_vm10 = vcmask 23552   ;;  %vm1469_vm11 = vcmask 31744   ;;  %vm1471_vm12 = vcmask 39936  }
  0x1b   :  { %83 = vmatpush1.bf16.msra.mxu1 %v1740_v7  ;;  %262 = vrot.lane.b32.xlu0 %v2033_v18, %s1902_s3 }
  0x1c   :  { %1605 = vmatprep.subr.bf16.mxu1 %v1900_v1  ;;  %1632 = vmatpush3.bf16.msra.mxu0 %v2030_v17 }
  0x1d   :  { %1645 = vmatprep.subr.bf16.mxu0 %v1900_v1 }
  0x1e   :  { %1528 = vmatmul.mubr.msk.bf16.vlgmr.msra.gmra.mrb[0].mxu1 %vm76_vm1, %v51_v10 }
  0x1f   :  { %1606 = vmatpush3.bf16.msra.mxu1 %v1741_v12  ;;  %1609 = vmatprep.mubr.msk.bf16.mxu1 %vm1901_vm0, %v1900_v1 }
  0x20   :  { %1607 = vmatprep.subr.bf16.mxu1 %v1900_v1 }
  0x23   :  { %1608 = vmatpush3.bf16.msra.mxu1 %v1742_v14 }
  0x24   :  { %1613 = vmatprep.subr.bf16.mxu1 %v1900_v1 }
  0x26   :  { %1610 = vmatmul.mubr.msk.bf16.vlgmr.msra.gmra.mrb[4].mxu1 %vm76_vm1, %v128_v19 }
  0x27   :  { %1614 = vmatpush3.bf16.msra.mxu1 %v2006_v11  ;;  %1617 = vmatprep.mubr.msk.bf16.mxu1 %vm1901_vm0, %v1900_v1 }
  0x28   :  { %1615 = vmatprep.subr.bf16.mxu1 %v1900_v1 }
  0x2b   :  { %1616 = vmatpush3.bf16.msra.mxu1 %v2030_v17 }
  0x2c   :  { %1621 = vmatprep.subr.bf16.mxu1 %v1900_v1 }
  0x2e   :  { %1618 = vmatmul.mubr.msk.bf16.vlgmr.msra.gmra.mrb[8].mxu1 %vm76_vm1, %v198_v21 }
  0x2f   :  { %1622 = vmatpush3.bf16.msra.mxu1 %v2006_v11  ;;  %1625 = vmatprep.mubr.msk.bf16.mxu1 %vm1901_vm0, %v1900_v1 }
  0x30   :  { %1623 = vmatprep.subr.bf16.mxu1 %v1900_v1 }
  0x33   :  { %1624 = vmatpush3.bf16.msra.mxu1 %v2030_v17 }
  0x34   :  { %1637 = vmatprep.subr.bf16.mxu1 %v1900_v1 }
  0x8d   :  { %v2068_v30 = vpop.permute.xlu0 %262 }
  0xf1   :  { %v2062_v22 = vpop.f32.mrb[0].mxu1 }
  0xf2   :  { %v2064_v23 = vpop.f32.mrb[1].mxu1 }
  0xf3   :  { %v118_v24 = vpop.f32.mrb[2].mxu1 }
  0xf4   :  { %v119_v25 = vpop.f32.mrb[3].mxu1 }
  0xf9   :  { %v186_v26 = vpop.f32.mrb[4].mxu1 }
  0xfa   :  { %v1611_v27 = vpop.f32.mrb[5].mxu1  ;;  %v2073_v36 = vadd.f32 %v186_v26, %v2033_v18 }
  0xfb   :  { %v2066_v28 = vpop.f32.mrb[6].mxu1 }
  0xfc   :  { %v1612_v29 = vpop.f32.mrb[7].mxu1 }
 0x101   :  { %v248_v31 = vpop.f32.mrb[8].mxu1 }
 0x102   :  { %v1619_v32 = vpop.f32.mrb[9].mxu1  ;;  %v265_v33 = vadd.f32 %v2068_v30, %v248_v31  ;;  %v254_v37 = vadd.f32 %v248_v31, %v2073_v36 }
 0x103   :  { %v251_v34 = vpop.f32.mrb[10].mxu1 }
 0x104   :  { %v1620_v35 = vpop.f32.mrb[11].mxu1  ;;  %267 = vrot.lane.b32.xlu0 %v265_v33, %s1903_s1  ;;  %v1535_v38 = vmul.f32 -1.442695, %v254_v37 }
 0x106   :  { %1755 = vpow2.f32 %v1535_v38 }
 0x110   :  { %v1756_v39 = vpop.eup %1755 }
 0x111   :  { %v258_v40 = vadd.f32 1.0, %v1756_v39 }
 0x113   :  { %1757 = vrcp.f32 %v258_v40 }
 0x11d   :  { %v1758_v41 = vpop.eup %1757 }
 0x176   :  { %v268_v42 = vpop.permute.xlu0 %267 }
 0x177   :  { %v270_v43 = vmul.f32 %v1758_v41, %v268_v42 }
 0x179   :  { %272 = vrot.lane.b32.xlu1 %v270_v43, %s1903_s1 }
 0x1eb   :  { %v273_v44 = vpop.permute.xlu1 %272 }
 0x1ec   :  { %v275_v45 = vadd.f32 %v273_v44, %v2073_v36 }
 0x1ee   :  { %1759 = vtanh.f32 %v275_v45 }
 0x1f8   :  { %v1760_v46 = vpop.eup %1759 }
 0x1f9   :  { %278 = vrot.lane.b32.xlu1 %v1760_v46, %s1903_s1 }
 0x26b   :  { %v279_v47 = vpop.permute.xlu1 %278 }
 0x26c   :  { %v281_v48 = vsub.f32 %v197_v20, %v279_v47 }
 0x26e   :  { %283 = vrot.lane.b32.xlu0 %v281_v48, %s1904_s25 }
 0x2e0   :  { %v284_v49 = vpop.permute.xlu0 %283 }
 0x2e1   :  { %v286_v50 = vmul.f32 %v1758_v41, %v284_v49 }
 0x2e3   :  { %288 = vrot.lane.b32.xlu1 %v286_v50, %s1904_s25 }
 0x355   :  { %v289_v51 = vpop.permute.xlu1 %288 }
 0x356   :  { %v2081_v52 = vadd.f32 %v1760_v46, %v289_v51 }
 0x358   :  { %v292_v53 = vpack.c.bf16 %v2081_v52, %v2081_v52 }
 0x35a   :  { %294 = vrot.lane.b32.xlu0 %v292_v53, %s1903_s1 }
 0x3cc   :  { %v295_v54 = vpop.permute.xlu0 %294 }
 0x3cd   :  { %1626 = vmatmul.mubr.msk.bf16.vlgmr.msra.gmra.mrb[12].mxu1 %vm76_vm1, %v295_v54 }
 0x3ce   :  { %1638 = vmatpush3.bf16.msra.mxu1 %v2006_v11  ;;  %1641 = vmatprep.mubr.msk.bf16.mxu1 %vm1901_vm0, %v1900_v1 }
 0x3cf   :  { %1639 = vmatprep.subr.bf16.mxu1 %v1900_v1 }
 0x3d2   :  { %1640 = vmatpush3.bf16.msra.mxu1 %v2030_v17 }
 0x3d3   :  { %1653 = vmatprep.subr.bf16.mxu1 %v1900_v1 }
 0x4a0   :  { %v2093_v55 = vpop.f32.mrb[12].mxu1 }
 0x4a1   :  { %v377_v56 = vadd.f32 %v2093_v55, %v2068_v30  ;;  %v1627_v57 = vpop.f32.mrb[13].mxu1  ;;  %v368_v61 = vrot.slane %v2093_v55, 6 }
 0x4a2   :  { %v336_v58 = vpop.f32.mrb[14].mxu1 }
 0x4a3   :  { %v1628_v59 = vpop.f32.mrb[15].mxu1  ;;  %v379_v60 = vrot.slane %v377_v56, 6  ;;  %v370_v62 = vadd.f32 %v368_v61, %v2073_v36 }
 0x4a5   :  { %380 = vrot.lane.b32.xlu1 %v379_v60, %s1903_s1  ;;  %v1537_v63 = vmul.f32 -1.442695, %v370_v62 }
 0x4a7   :  { %1761 = vpow2.f32 %v1537_v63 }
 0x4b1   :  { %v1762_v0 = vpop.eup %1761 }
 0x4b2   :  { %v374_v2 = vadd.f32 1.0, %v1762_v0 }
 0x4b4   :  { %1763 = vrcp.f32 %v374_v2 }
 0x4be   :  { %v1764_v3 = vpop.eup %1763 }
 0x517   :  { %v381_v4 = vpop.permute.xlu1 %380 }
 0x518   :  { %v383_v6 = vmul.f32 %v1764_v3, %v381_v4 }
 0x51a   :  { %385 = vrot.lane.b32.xlu0 %v383_v6, %s1903_s1 }
 0x58c   :  { %v386_v7 = vpop.permute.xlu0 %385 }
 0x58d   :  { %v388_v8 = vadd.f32 %v386_v7, %v2073_v36 }
 0x58f   :  { %1765 = vtanh.f32 %v388_v8 }
 0x599   :  { %v1766_v9 = vpop.eup %1765 }
 0x59a   :  { %v391_v10 = vrot.slane %v1766_v9, 2 }
 0x59c   :  { %v393_v12 = vsub.f32 %v2081_v52, %v391_v10 }
 0x59e   :  { %v395_v14 = vrot.slane %v393_v12, 6 }
 0x5a0   :  { %396 = vrot.lane.b32.xlu1 %v395_v14, %s1902_s3 }
 0x612   :  { %v397_v15 = vpop.permute.xlu1 %396 }
 0x613   :  { %v399_v16 = vmul.f32 %v1764_v3, %v397_v15 }
 0x615   :  { %401 = vrot.lane.b32.xlu0 %v399_v16, %s1904_s25 }
 0x687   :  { %v402_v19 = vpop.permute.xlu0 %401 }
 0x688   :  { %v2105_v20 = vadd.f32 %v1766_v9, %v402_v19 }
 0x68a   :  { %v405_v21 = vpack.c.bf16 %v2105_v20, %v2105_v20 }
 0x68c   :  { %v407_v24 = vrot.slane %v405_v21, 1 }
 0x68e   :  { %408 = vrot.lane.b32.xlu1 %v407_v24, %s1903_s1 }
 0x700   :  { %v409_v25 = vpop.permute.xlu1 %408 }
 0x701   :  { %1634 = vmatmul.mubr.msk.bf16.vlgmr.msra.gmra.mrb[0].mxu0 %vm76_vm1, %v409_v25 }
 0x702   :  { %1646 = vmatpush3.bf16.msra.mxu0 %v2006_v11  ;;  %1649 = vmatprep.mubr.msk.bf16.mxu0 %vm1901_vm0, %v1900_v1 }
 0x703   :  { %1647 = vmatprep.subr.bf16.mxu0 %v1900_v1 }
 0x706   :  { %1648 = vmatpush3.bf16.msra.mxu0 %v2030_v17 }
 0x707   :  { %1661 = vmatprep.subr.bf16.mxu0 %v1900_v1 }
 0x7d4   :  { %v2117_v26 = vpop.f32.mrb[0].mxu0 }
 0x7d5   :  { %v474_v27 = vadd.f32 %v2117_v26, %v2068_v30  ;;  %v1635_v29 = vpop.f32.mrb[1].mxu0  ;;  %v465_v34 = vrot.slane %v2117_v26, 4 }
 0x7d6   :  { %v450_v31 = vpop.f32.mrb[2].mxu0 }
 0x7d7   :  { %v1636_v32 = vpop.f32.mrb[3].mxu0  ;;  %v476_v33 = vrot.slane %v474_v27, 4  ;;  %v467_v35 = vadd.f32 %v465_v34, %v2073_v36 }
 0x7d9   :  { %477 = vrot.lane.b32.xlu0 %v476_v33, %s1903_s1  ;;  %v1539_v37 = vmul.f32 -1.442695, %v467_v35 }
 0x7db   :  { %1767 = vpow2.f32 %v1539_v37 }
 0x7e5   :  { %v1768_v38 = vpop.eup %1767 }
 0x7e6   :  { %v471_v39 = vadd.f32 1.0, %v1768_v38  ;;  %v2172_v38 = vadd.f32 %v2066_v28, %v2033_v18 }
 0x7e8   :  { %1769 = vrcp.f32 %v471_v39 }
 0x7f2   :  { %v1770_v40 = vpop.eup %1769 }
 0x84b   :  { %v478_v41 = vpop.permute.xlu0 %477 }
 0x84c   :  { %v480_v42 = vmul.f32 %v1770_v40, %v478_v41 }
 0x84e   :  { %482 = vrot.lane.b32.xlu1 %v480_v42, %s1903_s1 }
 0x8c0   :  { %v483_v43 = vpop.permute.xlu1 %482 }
 0x8c1   :  { %v485_v44 = vadd.f32 %v483_v43, %v2073_v36 }
 0x8c3   :  { %1771 = vtanh.f32 %v485_v44 }
 0x8cd   :  { %v1772_v45 = vpop.eup %1771 }
 0x8ce   :  { %v488_v46 = vrot.slane %v1772_v45, 2 }
 0x8d0   :  { %v490_v47 = vsub.f32 %v2105_v20, %v488_v46 }
 0x8d2   :  { %v492_v48 = vrot.slane %v490_v47, 6 }
 0x8d4   :  { %493 = vrot.lane.b32.xlu0 %v492_v48, %s1902_s3 }
 0x946   :  { %v494_v49 = vpop.permute.xlu0 %493 }
 0x947   :  { %v496_v50 = vmul.f32 %v1770_v40, %v494_v49 }
 0x949   :  { %498 = vrot.lane.b32.xlu1 %v496_v50, %s1904_s25 }
 0x9bb   :  { %v499_v51 = vpop.permute.xlu1 %498 }
 0x9bc   :  { %v2129_v53 = vadd.f32 %v1772_v45, %v499_v51 }
 0x9be   :  { %v502_v54 = vpack.c.bf16 %v2129_v53, %v2129_v53 }
 0x9c0   :  { %v504_v56 = vrot.slane %v502_v54, 2 }
 0x9c2   :  { %505 = vrot.lane.b32.xlu0 %v504_v56, %s1903_s1 }
 0xa34   :  { %v506_v57 = vpop.permute.xlu0 %505 }
 0xa35   :  { %1642 = vmatmul.mubr.msk.bf16.vlgmr.msra.gmra.mrb[16].mxu1 %vm76_vm1, %v506_v57 }
 0xa36   :  { %1654 = vmatpush3.bf16.msra.mxu1 %v2006_v11  ;;  %1657 = vmatprep.mubr.msk.bf16.mxu1 %vm1901_vm0, %v1900_v1 }
 0xa37   :  { %1655 = vmatprep.subr.bf16.mxu1 %v1900_v1 }
 0xa3a   :  { %1656 = vmatpush3.bf16.msra.mxu1 %v2030_v17 }
 0xa3b   :  { %1669 = vmatprep.subr.bf16.mxu1 %v1900_v1 }
 0xb08   :  { %v2141_v58 = vpop.f32.mrb[16].mxu1 }
 0xb09   :  { %v571_v59 = vadd.f32 %v2141_v58, %v2068_v30  ;;  %v1643_v60 = vpop.f32.mrb[17].mxu1  ;;  %v562_v0 = vrot.slane %v2141_v58, 2 }
 0xb0a   :  { %v547_v61 = vpop.f32.mrb[18].mxu1 }
 0xb0b   :  { %v1644_v62 = vpop.f32.mrb[19].mxu1  ;;  %v573_v63 = vrot.slane %v571_v59, 2  ;;  %v564_v2 = vadd.f32 %v562_v0, %v2073_v36 }
 0xb0d   :  { %574 = vrot.lane.b32.xlu1 %v573_v63, %s1903_s1  ;;  %v1541_v3 = vmul.f32 -1.442695, %v564_v2 }
 0xb0f   :  { %1773 = vpow2.f32 %v1541_v3 }
 0xb19   :  { %v1774_v4 = vpop.eup %1773 }
 0xb1a   :  { %v568_v6 = vadd.f32 1.0, %v1774_v4 }
 0xb1c   :  { %1775 = vrcp.f32 %v568_v6 }
 0xb26   :  { %v1776_v7 = vpop.eup %1775 }
 0xb7f   :  { %v575_v8 = vpop.permute.xlu1 %574 }
 0xb80   :  { %v577_v9 = vmul.f32 %v1776_v7, %v575_v8 }
 0xb82   :  { %579 = vrot.lane.b32.xlu0 %v577_v9, %s1903_s1 }
 0xbf4   :  { %v580_v10 = vpop.permute.xlu0 %579 }
 0xbf5   :  { %v582_v12 = vadd.f32 %v580_v10, %v2073_v36 }
 0xbf7   :  { %1777 = vtanh.f32 %v582_v12 }
 0xc01   :  { %v1778_v14 = vpop.eup %1777 }
 0xc02   :  { %v585_v15 = vrot.slane %v1778_v14, 2 }
 0xc04   :  { %v587_v16 = vsub.f32 %v2129_v53, %v585_v15 }
 0xc06   :  { %v589_v19 = vrot.slane %v587_v16, 6 }
 0xc08   :  { %590 = vrot.lane.b32.xlu1 %v589_v19, %s1902_s3 }
 0xc7a   :  { %v591_v21 = vpop.permute.xlu1 %590 }
 0xc7b   :  { %v593_v24 = vmul.f32 %v1776_v7, %v591_v21 }
 0xc7d   :  { %595 = vrot.lane.b32.xlu0 %v593_v24, %s1904_s25 }
 0xcef   :  { %v596_v25 = vpop.permute.xlu0 %595 }
 0xcf0   :  { %v2153_v27 = vadd.f32 %v1778_v14, %v596_v25 }
 0xcf2   :  { %v599_v29 = vpack.c.bf16 %v2153_v27, %v2153_v27 }
 0xcf4   :  { %v601_v31 = vrot.slane %v599_v29, 3 }
 0xcf6   :  { %602 = vrot.lane.b32.xlu1 %v601_v31, %s1903_s1 }
 0xd68   :  { %v603_v36 = vpop.permute.xlu1 %602 }
 0xd69   :  { %1650 = vmatmul.mubr.msk.bf16.vlgmr.msra.gmra.mrb[4].mxu0 %vm76_vm1, %v603_v36 }
 0xd6a   :  { %1662 = vmatpush3.bf16.msra.mxu0 %v2006_v11  ;;  %1665 = vmatprep.mubr.msk.bf16.mxu0 %vm1901_vm0, %v1900_v1 }
 0xd6b   :  { %1663 = vmatprep.subr.bf16.mxu0 %v1900_v1 }
 0xd6e   :  { %1664 = vmatpush3.bf16.msra.mxu0 %v2030_v17 }
 0xd6f   :  { %1677 = vmatprep.subr.bf16.mxu0 %v1900_v1 }
 0xe3c   :  { %v2165_v32 = vpop.f32.mrb[4].mxu0 }
 0xe3d   :  { %v665_v33 = vadd.f32 %v2165_v32, %v2068_v30  ;;  %v1651_v34 = vpop.f32.mrb[5].mxu0  ;;  %v658_v39 = vadd.f32 %v2165_v32, %v2172_v38 }
 0xe3e   :  { %v644_v35 = vpop.f32.mrb[6].mxu0 }
 0xe3f   :  { %667 = vrot.lane.b32.xlu0 %v665_v33, %s1903_s1  ;;  %v1652_v37 = vpop.f32.mrb[7].mxu0  ;;  %v1543_v40 = vmul.f32 -1.442695, %v658_v39 }
 0xe41   :  { %1779 = vpow2.f32 %v1543_v40 }
 0xe4b   :  { %v1780_v41 = vpop.eup %1779 }
 0xe4c   :  { %v662_v42 = vadd.f32 1.0, %v1780_v41 }
 0xe4e   :  { %1781 = vrcp.f32 %v662_v42 }
 0xe58   :  { %v1782_v43 = vpop.eup %1781 }
 0xeb1   :  { %v668_v44 = vpop.permute.xlu0 %667 }
 0xeb2   :  { %v670_v45 = vmul.f32 %v1782_v43, %v668_v44 }
 0xeb4   :  { %672 = vrot.lane.b32.xlu1 %v670_v45, %s1903_s1 }
 0xf26   :  { %v673_v46 = vpop.permute.xlu1 %672 }
 0xf27   :  { %v675_v47 = vadd.f32 %v673_v46, %v2172_v38 }
 0xf29   :  { %1783 = vtanh.f32 %v675_v47 }
 0xf33   :  { %v1784_v48 = vpop.eup %1783 }
 0xf34   :  { %v678_v18 = vrot.slane %v1784_v48, 2 }
 0xf36   :  { %v680_v28 = vsub.f32 %v2153_v27, %v678_v18 }
 0xf38   :  { %v682_v49 = vrot.slane %v680_v28, 6 }
 0xf3a   :  { %683 = vrot.lane.b32.xlu0 %v682_v49, %s1902_s3 }
 0xfac   :  { %v684_v50 = vpop.permute.xlu0 %683 }
 0xfad   :  { %v686_v51 = vmul.f32 %v1782_v43, %v684_v50 }
 0xfaf   :  { %688 = vrot.lane.b32.xlu1 %v686_v51, %s1904_s25 }
0x1021   :  { %v689_v54 = vpop.permute.xlu1 %688 }
0x1022   :  { %v2181_v56 = vadd.f32 %v1784_v48, %v689_v54 }
0x1024   :  { %v692_v57 = vpack.c.bf16 %v2181_v56, %v2181_v56 }
0x1026   :  { %694 = vrot.lane.b32.xlu0 %v692_v57, %s1903_s1 }
0x1098   :  { %v695_v59 = vpop.permute.xlu0 %694 }
0x1099   :  { %1658 = vmatmul.mubr.msk.bf16.vlgmr.msra.gmra.mrb[20].mxu1 %vm76_vm1, %v695_v59 }
0x109a   :  { %1670 = vmatpush3.bf16.msra.mxu1 %v2006_v11  ;;  %1673 = vmatprep.mubr.msk.bf16.mxu1 %vm1901_vm0, %v1900_v1 }
0x109b   :  { %1671 = vmatprep.subr.bf16.mxu1 %v1900_v1 }
0x109e   :  { %1672 = vmatpush3.bf16.msra.mxu1 %v2030_v17 }
0x109f   :  { %1685 = vmatprep.subr.bf16.mxu1 %v1900_v1 }
0x116c   :  { %v2193_v60 = vpop.f32.mrb[20].mxu1 }
0x116d   :  { %v760_v61 = vadd.f32 %v2193_v60, %v2068_v30  ;;  %v1659_v62 = vpop.f32.mrb[21].mxu1  ;;  %v751_v3 = vrot.slane %v2193_v60, 6 }
0x116e   :  { %v736_v63 = vpop.f32.mrb[22].mxu1 }
0x116f   :  { %v1660_v0 = vpop.f32.mrb[23].mxu1  ;;  %v762_v2 = vrot.slane %v760_v61, 6  ;;  %v753_v4 = vadd.f32 %v751_v3, %v2172_v38 }
0x1171   :  { %763 = vrot.lane.b32.xlu1 %v762_v2, %s1903_s1  ;;  %v1545_v6 = vmul.f32 -1.442695, %v753_v4 }
0x1173   :  { %1785 = vpow2.f32 %v1545_v6 }
0x117d   :  { %v1786_v7 = vpop.eup %1785 }
0x117e   :  { %v757_v8 = vadd.f32 1.0, %v1786_v7 }
0x1180   :  { %1787 = vrcp.f32 %v757_v8 }
0x118a   :  { %v1788_v9 = vpop.eup %1787 }
0x11e3   :  { %v764_v10 = vpop.permute.xlu1 %763 }
0x11e4   :  { %v766_v12 = vmul.f32 %v1788_v9, %v764_v10 }
0x11e6   :  { %768 = vrot.lane.b32.xlu0 %v766_v12, %s1903_s1 }
0x1258   :  { %v769_v14 = vpop.permute.xlu0 %768 }
0x1259   :  { %v771_v15 = vadd.f32 %v769_v14, %v2172_v38 }
0x125b   :  { %1789 = vtanh.f32 %v771_v15 }
0x1265   :  { %v1790_v16 = vpop.eup %1789 }
0x1266   :  { %v774_v19 = vrot.slane %v1790_v16, 2 }
0x1268   :  { %v776_v21 = vsub.f32 %v2181_v56, %v774_v19 }
0x126a   :  { %v778_v24 = vrot.slane %v776_v21, 6 }
0x126c   :  { %779 = vrot.lane.b32.xlu1 %v778_v24, %s1902_s3 }
0x12de   :  { %v780_v25 = vpop.permute.xlu1 %779 }
0x12df   :  { %v782_v29 = vmul.f32 %v1788_v9, %v780_v25 }
0x12e1   :  { %784 = vrot.lane.b32.xlu0 %v782_v29, %s1904_s25 }
0x1353   :  { %v785_v31 = vpop.permute.xlu0 %784 }
0x1354   :  { %v2205_v36 = vadd.f32 %v1790_v16, %v785_v31 }
0x1356   :  { %v788_v33 = vpack.c.bf16 %v2205_v36, %v2205_v36 }
0x1358   :  { %v790_v34 = vrot.slane %v788_v33, 1 }
0x135a   :  { %791 = vrot.lane.b32.xlu1 %v790_v34, %s1903_s1 }
0x13cc   :  { %v792_v35 = vpop.permute.xlu1 %791 }
0x13cd   :  { %1666 = vmatmul.mubr.msk.bf16.vlgmr.msra.gmra.mrb[8].mxu0 %vm76_vm1, %v792_v35 }
0x13ce   :  { %1678 = vmatpush3.bf16.msra.mxu0 %v2006_v11  ;;  %1681 = vmatprep.mubr.msk.bf16.mxu0 %vm1901_vm0, %v1900_v1 }
0x13cf   :  { %1679 = vmatprep.subr.bf16.mxu0 %v1900_v1 }
0x13d2   :  { %1680 = vmatpush3.bf16.msra.mxu0 %v2030_v17 }
0x13d3   :  { %1693 = vmatprep.subr.bf16.mxu0 %v1900_v1 }
0x14a0   :  { %v2217_v37 = vpop.f32.mrb[8].mxu0 }
0x14a1   :  { %v857_v39 = vadd.f32 %v2217_v37, %v2068_v30  ;;  %v1667_v40 = vpop.f32.mrb[9].mxu0  ;;  %v848_v11 = vrot.slane %v2217_v37, 4 }
0x14a2   :  { %v833_v41 = vpop.f32.mrb[10].mxu0 }
0x14a3   :  { %v1668_v42 = vpop.f32.mrb[11].mxu0  ;;  %v859_v43 = vrot.slane %v857_v39, 4  ;;  %v850_v44 = vadd.f32 %v848_v11, %v2172_v38  ;;  %v123_v39 = vsub.s32 1, %v1994_v5 }
0x14a5   :  { %860 = vrot.lane.b32.xlu0 %v859_v43, %s1903_s1  ;;  %v1547_v45 = vmul.f32 -1.442695, %v850_v44  ;;  %v124_v41 = vrot.slane %v2015_v13, %v123_v39 }
0x14a7   :  { %1791 = vpow2.f32 %v1547_v45  ;;  %v125_v43 = vadd.f32 %v124_v41, %v2062_v22  ;;  %v347_v45 = vsub.s32 2, %v1994_v5 }
0x14b1   :  { %v1792_v17 = vpop.eup %1791 }
0x14b2   :  { %v854_v46 = vadd.f32 1.0, %v1792_v17 }
0x14b4   :  { %1793 = vrcp.f32 %v854_v46  ;;  %v348_v46 = vrot.slane %v2015_v13, %v347_v45 }
0x14be   :  { %v1794_v47 = vpop.eup %1793 }
0x1517   :  { %v861_v48 = vpop.permute.xlu0 %860 }
0x1518   :  { %v863_v18 = vmul.f32 %v1794_v47, %v861_v48 }
0x151a   :  { %865 = vrot.lane.b32.xlu1 %v863_v18, %s1903_s1 }
0x158c   :  { %v866_v28 = vpop.permute.xlu1 %865 }
0x158d   :  { %v868_v49 = vadd.f32 %v866_v28, %v2172_v38 }
0x158f   :  { %1795 = vtanh.f32 %v868_v49 }
0x1599   :  { %v1796_v50 = vpop.eup %1795 }
0x159a   :  { %v871_v51 = vrot.slane %v1796_v50, 2 }
0x159c   :  { %v873_v54 = vsub.f32 %v2205_v36, %v871_v51 }
0x159e   :  { %v875_v57 = vrot.slane %v873_v54, 6 }
0x15a0   :  { %876 = vrot.lane.b32.xlu0 %v875_v57, %s1902_s3 }
0x1612   :  { %v877_v59 = vpop.permute.xlu0 %876 }
0x1613   :  { %v879_v61 = vmul.f32 %v1794_v47, %v877_v59 }
0x1615   :  { %881 = vrot.lane.b32.xlu1 %v879_v61, %s1904_s25 }
0x1687   :  { %v882_v62 = vpop.permute.xlu1 %881 }
0x1688   :  { %v2229_v63 = vadd.f32 %v1796_v50, %v882_v62 }
0x168a   :  { %v885_v0 = vpack.c.bf16 %v2229_v63, %v2229_v63 }
0x168c   :  { %v887_v2 = vrot.slane %v885_v0, 2 }
0x168e   :  { %888 = vrot.lane.b32.xlu0 %v887_v2, %s1903_s1 }
0x1700   :  { %v889_v3 = vpop.permute.xlu0 %888 }
0x1701   :  { %1674 = vmatmul.mubr.msk.bf16.vlgmr.msra.gmra.mrb[24].mxu1 %vm76_vm1, %v889_v3 }
0x1702   :  { %1689 = vmatprep.mubr.msk.bf16.mxu1 %vm1901_vm0, %v1900_v1 }
0x17d4   :  { %v2237_v4 = vpop.f32.mrb[24].mxu1 }
0x17d5   :  { %v954_v6 = vadd.f32 %v2237_v4, %v2068_v30  ;;  %v1675_v7 = vpop.f32.mrb[25].mxu1  ;;  %v945_v12 = vrot.slane %v2237_v4, 2 }
0x17d6   :  { %v930_v8 = vpop.f32.mrb[26].mxu1 }
0x17d7   :  { %v1676_v9 = vpop.f32.mrb[27].mxu1  ;;  %v956_v10 = vrot.slane %v954_v6, 2  ;;  %v947_v14 = vadd.f32 %v945_v12, %v2172_v38 }
0x17d9   :  { %957 = vrot.lane.b32.xlu1 %v956_v10, %s1903_s1  ;;  %v1549_v15 = vmul.f32 -1.442695, %v947_v14 }
0x17db   :  { %1797 = vpow2.f32 %v1549_v15 }
0x17e5   :  { %v1798_v16 = vpop.eup %1797 }
0x17e6   :  { %v951_v19 = vadd.f32 1.0, %v1798_v16 }
0x17e8   :  { %1799 = vrcp.f32 %v951_v19 }
0x17f2   :  { %v1800_v21 = vpop.eup %1799 }
0x184b   :  { %v958_v24 = vpop.permute.xlu1 %957 }
0x184c   :  { %v960_v25 = vmul.f32 %v1800_v21, %v958_v24 }
0x184e   :  { %962 = vrot.lane.b32.xlu0 %v960_v25, %s1903_s1 }
0x18c0   :  { %v963_v30 = vpop.permute.xlu0 %962 }
0x18c1   :  { %v965_v29 = vadd.f32 %v963_v30, %v2172_v38 }
0x18c3   :  { %1801 = vtanh.f32 %v965_v29 }
0x18cd   :  { %v1802_v31 = vpop.eup %1801 }
0x18ce   :  { %v968_v33 = vrot.slane %v1802_v31, 2 }
0x18d0   :  { %v970_v34 = vsub.f32 %v2229_v63, %v968_v33 }
0x18d2   :  { %v972_v35 = vrot.slane %v970_v34, 6 }
0x18d4   :  { %973 = vrot.lane.b32.xlu1 %v972_v35, %s1902_s3 }
0x1946   :  { %v974_v40 = vpop.permute.xlu1 %973 }
0x1947   :  { %v976_v42 = vmul.f32 %v1800_v21, %v974_v40 }
0x1949   :  { %978 = vrot.lane.b32.xlu0 %v976_v42, %s1904_s25 }
0x194d   :  { %340 = vrot.lane.b32.xlu0 %v125_v43, %s1902_s3 }
0x19bb   :  { %v979_v38 = vpop.permute.xlu0 %978 }
0x19bc   :  { %v2253_v11 = vadd.f32 %v1802_v31, %v979_v38 }
0x19be   :  { %v982_v44 = vpack.c.bf16 %v2253_v11, %v2253_v11 }
0x19bf   :  { %v341_v47 = vpop.permute.xlu0 %340 }
0x19c0   :  { %v984_v17 = vrot.slane %v982_v44, 3  ;;  %v343_v48 = vadd.f32 %v341_v47, %v2093_v55  ;;  %v453_v18 = vadd.f32 %v2117_v26, %v341_v47  ;;  %v550_v51 = vadd.f32 %v2141_v58, %v341_v47 }
0x19c1   :  { %v647_v54 = vadd.f32 %v2165_v32, %v341_v47  ;;  %v739_v62 = vadd.f32 %v2193_v60, %v341_v47  ;;  %v836_v0 = vadd.f32 %v2217_v37, %v341_v47  ;;  %v933_v6 = vadd.f32 %v2237_v4, %v341_v47 }
0x19c2   :  { %985 = vrot.lane.b32.xlu1 %v984_v17, %s1903_s1  ;;  %v344_v49 = vmax.f32 %v343_v48, 0.0  ;;  %v454_v50 = vmax.f32 %v453_v18, 0.0  ;;  %v551_v55 = vmax.f32 %v550_v51, 0.0  ;;  %v364_v44 = vsub.s32 6, %v1994_v5 }
0x19c3   :  { %v648_v26 = vmax.f32 %v647_v54, 0.0  ;;  %v740_v58 = vmax.f32 %v739_v62, 0.0  ;;  %v837_v32 = vmax.f32 %v836_v0, 0.0  ;;  %v934_v9 = vmax.f32 %v933_v6, 0.0 }
0x19c6   :  { %350 = vrot.lane.b32.xlu1 %v348_v46, %s1902_s3  ;;  %v2289_v46 = vrot.slane %v2015_v13, %v364_v44 }
0x1a34   :  { %v986_v28 = vpop.permute.xlu1 %985 }
0x1a35   :  { %1682 = vmatmul.mubr.msk.bf16.vlgmr.msra.gmra.mrb[12].mxu0 %vm76_vm1, %v986_v28 }
0x1a36   :  { %1709 = vmatprep.mubr.msk.bf16.mxu0 %vm1901_vm0, %v1900_v1 }
0x1a38   :  { %v351_v57 = vpop.permute.xlu1 %350 }
0x1a39   :  { %v353_v59 = vmul.f32 %v351_v57, %v344_v49  ;;  %v455_v61 = vmul.f32 %v454_v50, %v351_v57  ;;  %v552_v2 = vmul.f32 %v551_v55, %v351_v57  ;;  %v649_v3 = vmul.f32 %v648_v26, %v351_v57 }
0x1a3a   :  { %v741_v7 = vmul.f32 %v740_v58, %v351_v57  ;;  %v838_v8 = vmul.f32 %v837_v32, %v351_v57  ;;  %v935_v60 = vmul.f32 %v934_v9, %v351_v57 }
0x1a3b   :  { %355 = vrot.lane.b32.xlu0 %v353_v59, %s1904_s25  ;;  %457 = vrot.lane.b32.xlu1 %v455_v61, %s1904_s25 }
0x1a3f   :  { %554 = vrot.lane.b32.xlu0 %v552_v2, %s1904_s25  ;;  %651 = vrot.lane.b32.xlu1 %v649_v3, %s1904_s25 }
0x1a43   :  { %743 = vrot.lane.b32.xlu0 %v741_v7, %s1904_s25  ;;  %840 = vrot.lane.b32.xlu1 %v838_v8, %s1904_s25 }
0x1a47   :  { %937 = vrot.lane.b32.xlu0 %v935_v60, %s1904_s25 }
0x1aad   :  { %v356_v37 = vpop.permute.xlu0 %355  ;;  %v458_v10 = vpop.permute.xlu1 %457 }
0x1aae   :  { %v359_v12 = vsel %vm358_vm2, %v356_v37, 0.0  ;;  %v460_v39 = vsel %vm358_vm2, %v458_v10, 0.0 }
0x1aaf   :  { %360 = vadd.xlane.f32.xlu0 %v359_v12 }
0x1ab1   :  { %v555_v14 = vpop.permute.xlu0 %554  ;;  %v652_v15 = vpop.permute.xlu1 %651 }
0x1ab2   :  { %v557_v4 = vsel %vm358_vm2, %v555_v14, 0.0  ;;  %v654_v16 = vsel %vm358_vm2, %v652_v15, 0.0 }
0x1ab3   :  { %558 = vadd.xlane.f32.xlu0 %v557_v4 }
0x1ab5   :  { %v841_v19 = vpop.permute.xlu1 %840  ;;  %v744_v35 = vpop.permute.xlu0 %743 }
0x1ab6   :  { %v843_v21 = vsel %vm358_vm2, %v841_v19, 0.0  ;;  %v746_v40 = vsel %vm358_vm2, %v744_v35, 0.0 }
0x1ab7   :  { %655 = vadd.xlane.f32.xlu0 %v654_v16 }
0x1ab9   :  { %v938_v41 = vpop.permute.xlu0 %937 }
0x1aba   :  { %v940_v42 = vsel %vm358_vm2, %v938_v41, 0.0 }
0x1abb   :  { %844 = vadd.xlane.f32.xlu0 %v843_v21 }
0x1b08   :  { %v1024_v24 = vpop.f32.mrb[12].mxu0 }
0x1b09   :  { %v1030_v25 = vadd.f32 %v1024_v24, %v341_v47  ;;  %v1683_v30 = vpop.f32.mrb[13].mxu0 }
0x1b0a   :  { %v1027_v29 = vpop.f32.mrb[14].mxu0 }
0x1b0b   :  { %v1031_v31 = vmax.f32 %v1030_v25, 0.0  ;;  %v1684_v33 = vpop.f32.mrb[15].mxu0 }
0x1b0d   :  { %v1032_v34 = vmul.f32 %v1031_v31, %v351_v57 }
0x1b0f   :  { %1034 = vrot.lane.b32.xlu1 %v1032_v34, %s1904_s25 }
0x1b33   :  { %461 = vadd.xlane.f32.xlu1 %v460_v39 }
0x1b37   :  { %747 = vadd.xlane.f32.xlu1 %v746_v40 }
0x1b3b   :  { %941 = vadd.xlane.f32.xlu1 %v940_v42 }
0x1b3c   :  { %v361_v45 = vpop.xlane.xlu0 %360 }
0x1b3d   :  { %v366_v18 = vadd.f32 %v2289_v46, %v361_v45 }
0x1b40   :  { %v559_v48 = vpop.xlane.xlu0 %558 }
0x1b41   :  { %v560_v49 = vadd.f32 %v559_v48, %v2289_v46 }
0x1b44   :  { %v656_v50 = vpop.xlane.xlu0 %655 }
0x1b45   :  { %v657_v54 = vadd.f32 %v656_v50, %v2289_v46  ;;  %v1100_v50 = vrot.slane %v2105_v20, 2 }
0x1b48   :  { %v845_v55 = vpop.xlane.xlu0 %844 }
0x1b49   :  { %v846_v13 = vadd.f32 %v845_v55, %v2289_v46 }
0x1b81   :  { %v1035_v43 = vpop.permute.xlu1 %1034 }
0x1b82   :  { %v1037_v38 = vsel %vm358_vm2, %v1035_v43, 0.0 }
0x1b83   :  { %1038 = vadd.xlane.f32.xlu0 %v1037_v38 }
0x1bc0   :  { %v462_v17 = vpop.xlane.xlu1 %461 }
0x1bc1   :  { %v463_v47 = vadd.f32 %v462_v17, %v2289_v46 }
0x1bc3   :  { %v1041_v28 = vmax.f32 %v366_v18, %v463_v47 }
0x1bc4   :  { %v748_v57 = vpop.xlane.xlu1 %747 }
0x1bc5   :  { %v1042_v51 = vmax.f32 %v1041_v28, %v560_v49  ;;  %v749_v61 = vadd.f32 %v748_v57, %v2289_v46  ;;  %v1122_v57 = vrot.slane %v2153_v27, 6  ;;  %v1139_v27 = vrot.slane %v2205_v36, 2 }
0x1bc7   :  { %v1043_v59 = vmax.f32 %v1042_v51, %v657_v54  ;;  %v1111_v51 = vrot.slane %v2129_v53, 4 }
0x1bc8   :  { %v942_v62 = vpop.xlane.xlu1 %941 }
0x1bc9   :  { %v1044_v26 = vmax.f32 %v1043_v59, %v749_v61  ;;  %v943_v2 = vadd.f32 %v942_v62, %v2289_v46 }
0x1bcb   :  { %v1045_v0 = vmax.f32 %v1044_v26, %v846_v13 }
0x1bcd   :  { %v1046_v58 = vmax.f32 %v1045_v0, %v943_v2 }
0x1c10   :  { %v1039_v3 = vpop.xlane.xlu0 %1038 }
0x1c11   :  { %v1040_v32 = vadd.f32 %v1039_v3, %v2289_v46 }
0x1c13   :  { %v1047_v6 = vmax.f32 %v1046_v58, %v1040_v32 }
0x1c15   :  { %v1048_v7 = vsub.f32 %v366_v18, %v1047_v6  ;;  %v1051_v8 = vsub.f32 %v463_v47, %v1047_v6  ;;  %v1054_v9 = vsub.f32 %v560_v49, %v1047_v6  ;;  %v1057_v60 = vsub.f32 %v657_v54, %v1047_v6 }
0x1c16   :  { %v1060_v14 = vsub.f32 %v749_v61, %v1047_v6  ;;  %v1063_v4 = vsub.f32 %v846_v13, %v1047_v6  ;;  %v1066_v19 = vsub.f32 %v943_v2, %v1047_v6  ;;  %v1069_v24 = vsub.f32 %v1040_v32, %v1047_v6 }
0x1c17   :  { %v1049_v37 = vmul.f32 1.442695, %v1048_v7  ;;  %v1052_v10 = vmul.f32 1.442695, %v1051_v8  ;;  %v1055_v12 = vmul.f32 1.442695, %v1054_v9 }
0x1c18   :  { %v1058_v15 = vmul.f32 1.442695, %v1057_v60  ;;  %v1061_v16 = vmul.f32 1.442695, %v1060_v14  ;;  %v1064_v21 = vmul.f32 1.442695, %v1063_v4 }
0x1c19   :  { %1803 = vpow2.f32 %v1049_v37  ;;  %v1067_v25 = vmul.f32 1.442695, %v1066_v19  ;;  %v1070_v30 = vmul.f32 1.442695, %v1069_v24  ;;  %v1150_v49 = vrot.slane %v2229_v63, 4  ;;  %v1745_v4 = vld [vmem:[%s2459_s6] sm:$0xff]  }
0x1c1a   :  { %1805 = vpow2.f32 %v1052_v10  ;;  %v1161_v61 = vrot.slane %v2253_v11, 6  ;;  %1686 = vmatpush3.bf16.msra.mxu1 %v1745_v4 }
0x1c1b   :  { %1807 = vpow2.f32 %v1055_v12  ;;  %1687 = vmatprep.subr.bf16.mxu1 %v1900_v1 }
0x1c1c   :  { %1809 = vpow2.f32 %v1058_v15 }
0x1c1d   :  { %1811 = vpow2.f32 %v1061_v16  ;;  %v1746_v16 = vld [vmem:[%s2459_s6 + $0x8] sm:$0xff]   ;;  %s1905_s6 = smov 1  }
0x1c1e   :  { %1813 = vpow2.f32 %v1064_v21  ;;  %1688 = vmatpush3.bf16.msra.mxu1 %v1746_v16 }
0x1c1f   :  { %1815 = vpow2.f32 %v1067_v25 }
0x1c20   :  { %1817 = vpow2.f32 %v1070_v30 }
0x1c23   :  { %v1804_v29 = vpop.eup %1803 }
0x1c24   :  { %v1806_v31 = vpop.eup %1805 }
0x1c25   :  { %v1072_v33 = vadd.f32 %v1806_v31, %v1804_v29  ;;  %v1808_v34 = vpop.eup %1807 }
0x1c26   :  { %v1810_v39 = vpop.eup %1809 }
0x1c27   :  { %v1073_v35 = vadd.f32 %v1808_v34, %v1072_v33  ;;  %v1812_v41 = vpop.eup %1811 }
0x1c28   :  { %v1814_v43 = vpop.eup %1813 }
0x1c29   :  { %v1074_v40 = vadd.f32 %v1810_v39, %v1073_v35  ;;  %v1816_v44 = vpop.eup %1815 }
0x1c2a   :  { %v1818_v17 = vpop.eup %1817 }
0x1c2b   :  { %v1075_v42 = vadd.f32 %v1812_v41, %v1074_v40 }
0x1c2d   :  { %v1076_v38 = vadd.f32 %v1814_v43, %v1075_v42 }
0x1c2f   :  { %v1077_v45 = vadd.f32 %v1816_v44, %v1076_v38 }
0x1c31   :  { %v1078_v47 = vadd.f32 %v1818_v17, %v1077_v45 }
0x1c33   :  { %1819 = vrcp.f32 %v1078_v47 }
0x1c3d   :  { %v1820_v48 = vpop.eup %1819 }
0x1c3e   :  { %v2299_v18 = vmul.f32 %v1820_v48, %v1808_v34  ;;  %v2301_v28 = vmul.f32 %v1820_v48, %v1806_v31  ;;  %v2310_v54 = vmul.f32 %v1820_v48, %v1804_v29  ;;  %v2316_v59 = vmul.f32 %v1820_v48, %v1810_v39 }
0x1c3f   :  { %v2319_v20 = vmul.f32 %v1820_v48, %v1814_v43  ;;  %v2322_v63 = vmul.f32 %v1820_v48, %v1816_v44  ;;  %v2325_v53 = vmul.f32 %v1820_v48, %v1818_v17  ;;  %v2334_v55 = vmul.f32 %v1820_v48, %v1812_v41 }
0x1c40   :  { %1107 = vperm.xlu0 %1734, %v2299_v18   ;;  %1096 = vperm.xlu1 %1733, %v2301_v28  }
0x1c44   :  { %1151 = vrot.lane.b32.xlu0 %v1150_v49, %s1903_s1  ;;  %1101 = vrot.lane.b32.xlu1 %v1100_v50, %s1903_s1 }
0x1c48   :  { %1112 = vrot.lane.b32.xlu1 %v1111_v51, %s1903_s1  ;;  %1090 = vperm.xlu0 %1734, %v2310_v54  }
0x1c4c   :  { %1123 = vrot.lane.b32.xlu1 %v1122_v57, %s1903_s1 }
0x1c50   :  { %1118 = vperm.xlu1 %1733, %v2316_v59  }
0x1c54   :  { %1135 = vperm.xlu1 %1733, %v2319_v20  }
0x1c58   :  { %1146 = vperm.xlu1 %1733, %v2322_v63  }
0x1c5c   :  { %1157 = vperm.xlu1 %1733, %v2325_v53  }
0x1c60   :  { %1140 = vrot.lane.b32.xlu1 %v1139_v27, %s1903_s1 }
0x1c64   :  { %1162 = vrot.lane.b32.xlu1 %v1161_v61, %s1903_s1 }
0x1c68   :  { %1129 = vperm.xlu1 %1733, %v2334_v55  }
0x1cbf   :  { %v1097_v26 = vpop.permute.xlu1 %1096  ;;  %v1108_v0 = vpop.permute.xlu0 %1107 }
0x1cc3   :  { %v1102_v13 = vpop.permute.xlu1 %1101  ;;  %v1152_v7 = vpop.permute.xlu0 %1151 }
0x1cc4   :  { %v1104_v62 = vmul.f32 %v1102_v13, %v1097_v26 }
0x1cc6   :  { %1215 = vrot.lane.b32.xlu0 %v1104_v62, %s1903_s1  ;;  %v1167_v15 = vrot.slane %v1104_v62, 6 }
0x1cc7   :  { %v1113_v2 = vpop.permute.xlu1 %1112 }
0x1cc8   :  { %v1115_v36 = vmul.f32 %v1113_v2, %v1108_v0 }
0x1cca   :  { %1219 = vrot.lane.b32.xlu1 %v1115_v36, %s1903_s1 }
0x1ccb   :  { %v1124_v3 = vpop.permute.xlu1 %1123 }
0x1ccf   :  { %v1119_v58 = vpop.permute.xlu1 %1118 }
0x1cd0   :  { %v1126_v32 = vmul.f32 %v1124_v3, %v1119_v58 }
0x1cd2   :  { %1223 = vrot.lane.b32.xlu0 %v1126_v32, %s1903_s1  ;;  %v1177_v19 = vrot.slane %v1126_v32, 2  ;;  %v1747_v32 = vld [vmem:[%s2460_s7] sm:$0xff]  }
0x1cd3   :  { %v1136_v6 = vpop.permute.xlu1 %1135  ;;  %1694 = vmatpush3.bf16.msra.mxu0 %v1747_v32 }
0x1cd4   :  { %1695 = vmatprep.subr.bf16.mxu0 %v1900_v1 }
0x1cd7   :  { %v1147_v8 = vpop.permute.xlu1 %1146 }
0x1cd8   :  { %v1154_v9 = vmul.f32 %v1152_v7, %v1147_v8  ;;  %v1314_v8 = vsub.s32 3, %v1994_v5 }
0x1cda   :  { %1232 = vrot.lane.b32.xlu0 %v1154_v9, %s1903_s1  ;;  %v1187_v21 = vrot.slane %v1154_v9, 4  ;;  %v1825_v9 = vld [vmem:[%s2461_s8] sm:$0xff]  ;;  %s1913_s8 = smov [#allocation6]  }
0x1cdb   :  { %v1158_v60 = vpop.permute.xlu1 %1157  ;;  %s1508_s2 = sshll.u32 %s1913_s8, 4  ;;  %s1509_s2 = int_to_ptr.vmem [resolvable:$true] %s1508_s2 }
0x1cdc   :  { %s1848_s28 = scalar_lea.vmem %s1509_s2, 256  ;;  %p1853_p9 = scmp.lt.s32.totalorder %s1509_s2, %s1509_s2 }
0x1cdd   :  { %p1849_p8 = scmp.ne.s32.totalorder %s1509_s2, %s1848_s28  ;;  %p1854_p10 = scmp.lt.s32.totalorder %s1848_s28, %s1848_s28 }
0x1cdf   :  { %v1141_v37 = vpop.permute.xlu1 %1140  ;;  %p1855_p11 = por %p1854_p10, %p1853_p9 }
0x1ce0   :  { %v1143_v10 = vmul.f32 %v1141_v37, %v1136_v6  ;;  %v1748_v6 = vld [vmem:[%s2460_s7 + $0x8] sm:$0xff]  }
0x1ce1   :  { %1696 = vmatpush3.bf16.msra.mxu0 %v1748_v6  ;;  %p1856_p12 = pnand %p1855_p11, %p1849_p8 }
0x1ce2   :  { %1228 = vrot.lane.b32.xlu1 %v1143_v10, %s1903_s1  ;;  %v1182_v47 = vrot.slane %v1143_v10, 6  ;;  %1697 = vmatprep.subr.bf16.mxu0 %v1900_v1 }
0x1ce3   :  { %v1163_v12 = vpop.permute.xlu1 %1162 }
0x1ce4   :  { %v1165_v14 = vmul.f32 %v1163_v12, %v1158_v60  ;;  %v1315_v60 = vrot.slane %v1825_v9, %v1314_v8 }
0x1ce6   :  { %1236 = vrot.lane.b32.xlu1 %v1165_v14, %s1903_s1 }
0x1ce7   :  { %v1130_v24 = vpop.permute.xlu1 %1129 }
0x1ce8   :  { %v1132_v39 = vmul.f32 %v1130_v24, %v2181_v56  ;;  %v1192_v56 = vrot.slane %v1165_v14, 2 }
0x1cea   :  { %1262 = vrot.lane.b32.xlu1 %v2062_v22, %s1902_s3  ;;  %v1091_v22 = vpop.permute.xlu0 %1090 }
0x1ceb   :  { %v1093_v30 = vmul.f32 %v1091_v22, %v2081_v52  ;;  %v1172_v52 = vrot.slane %v1115_v36, 4 }
0x1cee   :  { %1168 = vrot.lane.b32.xlu1 %v1167_v15, %s1903_s1 }
0x1cf2   :  { %1178 = vrot.lane.b32.xlu1 %v1177_v19, %s1903_s1  ;;  %v1336_v19 = vsub.s32 4, %v1994_v5 }
0x1cf4   :  { %v1337_v22 = vrot.slane %v1825_v9, %v1336_v19 }
0x1cf6   :  { %1188 = vrot.lane.b32.xlu1 %v1187_v21, %s1903_s1  ;;  %v1428_v21 = vsub.s32 5, %v1994_v5 }
0x1cf8   :  { %v1429_v24 = vrot.slane %v1825_v9, %v1428_v21 }
0x1d38   :  { %v1216_v25 = vpop.permute.xlu0 %1215 }
0x1d39   :  { %v1218_v31 = vadd.f32 %v1216_v25, %v1093_v30 }
0x1d3c   :  { %v1220_v29 = vpop.permute.xlu1 %1219 }
0x1d3d   :  { %v1222_v34 = vadd.f32 %v1220_v29, %v1218_v31 }
0x1d44   :  { %v1224_v33 = vpop.permute.xlu0 %1223 }
0x1d45   :  { %v1226_v35 = vadd.f32 %v1224_v33, %v1222_v34 }
0x1d47   :  { %v1227_v40 = vadd.f32 %v1226_v35, %v1132_v39 }
0x1d4c   :  { %v1233_v43 = vpop.permute.xlu0 %1232 }
0x1d54   :  { %v1229_v41 = vpop.permute.xlu1 %1228 }
0x1d55   :  { %v1231_v42 = vadd.f32 %v1229_v41, %v1227_v40 }
0x1d57   :  { %v1235_v38 = vadd.f32 %v1233_v43, %v1231_v42 }
0x1d58   :  { %v1237_v44 = vpop.permute.xlu1 %1236 }
0x1d59   :  { %v1239_v45 = vadd.f32 %v1237_v44, %v1235_v38 }
0x1d5b   :  { %v1240_v17 = vpack.c.bf16 %v1239_v45, %v1239_v45 }
0x1d5c   :  { %v2363_v48 = vpop.permute.xlu1 %1262 }
0x1d5d   :  { %1246 = vrot.lane.b32.xlu0 %v1240_v17, %s1903_s1 }
0x1d60   :  { %v1169_v50 = vpop.permute.xlu1 %1168 }
0x1d61   :  { %1264 = vrot.lane.b32.xlu0 %v2064_v23, %s1902_s3  ;;  %v1197_v23 = vsel %vm1196_vm3, %v1093_v30, %v1169_v50 }
0x1d64   :  { %v1179_v27 = vpop.permute.xlu1 %1178 }
0x1d65   :  { %1173 = vrot.lane.b32.xlu0 %v1172_v52, %s1903_s1 }
0x1d68   :  { %v1189_v2 = vpop.permute.xlu1 %1188 }
0x1d69   :  { %1183 = vrot.lane.b32.xlu0 %v1182_v47, %s1903_s1 }
0x1d6d   :  { %1193 = vrot.lane.b32.xlu0 %v1192_v56, %s1903_s1 }
0x1dcf   :  { %v1247_v49 = vpop.permute.xlu0 %1246 }
0x1dd0   :  { %1690 = vmatmul.mubr.msk.bf16.vlgmr.msra.gmra.mrb[28].mxu1 %vm76_vm1, %v1247_v49 }
0x1dd3   :  { %v2366_v51 = vpop.permute.xlu0 %1264 }
0x1dd4   :  { %v1267_v37 = vsel %vm1266_vm6, %v2363_v48, %v2366_v51 }
0x1dd7   :  { %v1174_v57 = vpop.permute.xlu0 %1173 }
0x1dd8   :  { %v1199_v26 = vsel %vm1198_vm4, %v1197_v23, %v1174_v57 }
0x1dd9   :  { %v1201_v13 = vsel %vm1200_vm5, %v1199_v26, %v1179_v27 }
0x1dda   :  { %1207 = vrot.lane.b32.xlu1 %v1201_v13, %s1903_s1 }
0x1ddb   :  { %v1184_v62 = vpop.permute.xlu0 %1183 }
0x1ddc   :  { %v1202_v0 = vsel %vm1196_vm3, %v1132_v39, %v1184_v62 }
0x1ddd   :  { %v1203_v3 = vsel %vm1198_vm4, %v1202_v0, %v1189_v2 }
0x1ddf   :  { %v1194_v36 = vpop.permute.xlu0 %1193 }
0x1de0   :  { %v1204_v58 = vsel %vm1200_vm5, %v1203_v3, %v1194_v36 }
0x1de1   :  { %1209 = vrot.lane.b32.xlu0 %v1204_v58, %s1903_s1 }
0x1de5   :  { %1442 = vrot.lane.b32.xlu0 %v2301_v28, %s1905_s6  ;;  %v1750_v28 = vld [vmem:[%s2460_s7 + $0x18] sm:$0xff]  }
0x1de9   :  { %1445 = vrot.lane.b32.xlu0 %v2299_v18, %s1906_s29  ;;  %v1749_v18 = vld [vmem:[%s2460_s7 + $0x10] sm:$0xff]  }
0x1dea   :  { %1698 = vmatpush3.bf16.msra.mxu0 %v1749_v18 }
0x1deb   :  { %1699 = vmatprep.subr.bf16.mxu0 %v1900_v1 }
0x1ded   :  { %1448 = vrot.lane.b32.xlu0 %v2316_v59, %s1907_s30  ;;  %v1751_v59 = vld [vmem:[%s2460_s7 + $0x20] sm:$0xff]  }
0x1dee   :  { %1700 = vmatpush3.bf16.msra.mxu0 %v1750_v28 }
0x1def   :  { %1701 = vmatprep.subr.bf16.mxu0 %v1900_v1 }
0x1df1   :  { %1451 = vrot.lane.b32.xlu0 %v2334_v55, %s1908_s13 }
0x1df2   :  { %1702 = vmatpush3.bf16.msra.mxu0 %v1751_v59 }
0x1df3   :  { %1703 = vmatprep.subr.bf16.mxu0 %v1900_v1 }
0x1df5   :  { %1454 = vrot.lane.b32.xlu0 %v2319_v20, %s1909_s5  ;;  %v1752_v20 = vld [vmem:[%s2460_s7 + $0x28] sm:$0xff]  }
0x1df6   :  { %1704 = vmatpush3.bf16.msra.mxu0 %v1752_v20 }
0x1df7   :  { %1705 = vmatprep.subr.bf16.mxu0 %v1900_v1 }
0x1df9   :  { %1457 = vrot.lane.b32.xlu0 %v2322_v63, %s1910_s18  ;;  %v1753_v63 = vld [vmem:[%s2460_s7 + $0x30] sm:$0xff]  }
0x1dfa   :  { %1706 = vmatpush3.bf16.msra.mxu0 %v1753_v63 }
0x1dfb   :  { %1707 = vmatprep.subr.bf16.mxu0 %v1900_v1 }
0x1dfd   :  { %1460 = vrot.lane.b32.xlu0 %v2325_v53, %s1911_s21  ;;  %v1754_v53 = vld [vmem:[%s2460_s7 + $0x38] sm:$0xff]   ;;  %s1912_s7 = smov 73  }
0x1dfe   :  { %1708 = vmatpush3.bf16.msra.mxu0 %v1754_v53 }
0x1e4c   :  { %v1208_v55 = vpop.permute.xlu1 %1207 }
0x1e4d   :  { %1213 = vst.msk [vmem:[#allocation6] sm:$0xff] %vm76_vm1, %v1208_v55 }
0x1e53   :  { %v1210_v7 = vpop.permute.xlu0 %1209 }
0x1e54   :  { %1214 = vst.msk [vmem:[#allocation6 + $0x8] sm:$0xff] %vm76_vm1, %v1210_v7 }
0x1e57   :  { %v1443_v39 = vpop.permute.xlu0 %1442 }
0x1e58   :  { %v1464_v11 = vsel %vm1463_vm8, %v2310_v54, %v1443_v39 }
0x1e5b   :  { %v1446_v40 = vpop.permute.xlu0 %1445 }
0x1e5f   :  { %v1449_v43 = vpop.permute.xlu0 %1448 }
0x1e63   :  { %v1452_v38 = vpop.permute.xlu0 %1451 }
0x1e67   :  { %v1455_v17 = vpop.permute.xlu0 %1454 }
0x1e6b   :  { %v1458_v52 = vpop.permute.xlu0 %1457 }
0x1ea3   :  { %v1306_v10 = vpop.f32.mrb[28].mxu1 }
0x1ea4   :  { %v1307_v1 = vadd.f32 %v1306_v10, %v1267_v37  ;;  %v1691_v12 = vpop.f32.mrb[29].mxu1 }
0x1ea5   :  { %v1309_v14 = vpop.f32.mrb[30].mxu1 }
0x1ea6   :  { %v1316_v15 = vadd.f32 %v1315_v60, %v1307_v1  ;;  %v1692_v4 = vpop.f32.mrb[31].mxu1 }
0x1ea8   :  { %v1317_v16 = vpack.c.bf16 %v1316_v15, %v1316_v15 }
0x1eaa   :  { %1710 = vmatmul.mubr.bf16.vlgmr.msra.gmra.mrb[16].mxu0 %v1317_v16 }
0x1f7d   :  { %v1420_v25 = vpop.f32.mrb[16].mxu0 }
0x1f7e   :  { %v1421_v30 = vadd.f32 %v1420_v25, %v1337_v22  ;;  %v1711_v29 = vpop.f32.mrb[17].mxu0 }
0x1f7f   :  { %v1423_v31 = vpop.f32.mrb[18].mxu0 }
0x1f80   :  { %v1712_v33 = vpop.f32.mrb[19].mxu0  ;;  %v1430_v34 = vmul.f32 %v1429_v24, %v1421_v30 }
0x1f82   :  { %v1432_v35 = vsel %vm1431_vm7, %v1430_v34, 0.0 }
0x1f83   :  { %1433 = vadd.xlane.f32.xlu1 %v1432_v35 }
0x1f94   :  { %1485 = vrot.lane.b32.xlu1 %v1161_v61, %s1912_s7 }
0x2010   :  { %v1434_v41 = vpop.xlane.xlu1 %1433 }
0x2011   :  { %v1435_v5 = vadd.f32 %v1434_v41, %v2289_v46  ;;  %v1466_v46 = vsel %vm1465_vm9, %v1464_v11, %v1446_v40 }
0x2013   :  { %v1562_v42 = vmul.f32 -1.442695, %v1435_v5 }
0x2015   :  { %1821 = vpow2.f32 %v1562_v42 }
0x201f   :  { %v1822_v44 = vpop.eup %1821 }
0x2020   :  { %v1439_v45 = vadd.f32 1.0, %v1822_v44 }
0x2022   :  { %1823 = vrcp.f32 %v1439_v45 }
0x2023   :  { %1859 = shalt.err (!%p1856_p12)
}
0x2024   :  { %s1860_s11 = scalar_lea.hbm %s2463_s10, 256 }
0x2025   :  { %p1861_p13 = scmp.ne.s32.totalorder %s2463_s10, %s1860_s11  ;;  %p1864_p0 = scmp.lt.u32.totalorder %s1860_s11, %s2463_s10 }
0x2027   :  { %p1866_p1 = pnand %p1864_p0, %p1861_p13 }
0x2029   :  { %1869 = shalt.err (!%p1866_p1)
}
0x202a   :  { %s1914_s5 = smov 128   ;;  %s1915_s16 = smov 8   ;;  %v1468_v61 = vsel %vm1467_vm10, %v1466_v46, %v1449_v43  ;;  %vm1473_vm13 = vcmask 48128   ;;  %vm1475_vm14 = vcmask 56320   ;;  %v1461_v56 = vpop.permute.xlu0 %1460  ;;  %vm1489_vm15 = vcmask 72704   ;;  %v1486_v57 = vpop.permute.xlu1 %1485 }
0x202b   :  { %1514 = dma.vmem_to_hbm [thread:$0]  %s1509_s2, 256, %s2463_s10, [#allocation7], %s1914_s5, %s1914_s5, %s1915_s16   ;;  %v1470_v47 = vsel %vm1469_vm11, %v1468_v61, %v1452_v38  ;;  %vm1491_vm0 = vcmask 328704  }
0x202c   :  { %v1824_v54 = vpop.eup %1823  ;;  %s1916_s19 = smov 127   ;;  %v1472_v48 = vsel %vm1471_vm12, %v1470_v47, %v1455_v17  ;;  %s1917_s20 = smov [#allocation5]  }
0x202d   :  { %1478 = vrot.lane.b32.xlu0 %v1824_v54, %s1916_s19  ;;  %v1474_v49 = vsel %vm1473_vm13, %v1472_v48, %v1458_v52  ;;  %s1499_s21 = sshll.u32 %s1917_s20, 4  ;;  %s1500_s21 = int_to_ptr.vmem [resolvable:$true] %s1499_s21 }
0x202e   :  { %v1476_v50 = vsel %vm1475_vm14, %v1474_v49, %v1461_v56  ;;  %s1870_s10 = scalar_lea.vmem %s1500_s21, 32  ;;  %p1875_p3 = scmp.lt.s32.totalorder %s1500_s21, %s1500_s21 }
0x202f   :  { %p1871_p2 = scmp.ne.s32.totalorder %s1500_s21, %s1870_s10  ;;  %p1876_p4 = scmp.lt.s32.totalorder %s1870_s10, %s1870_s10 }
0x2031   :  { %1482 = vrot.lane.b32.xlu0 %v1476_v50, %s1905_s6  ;;  %p1877_p5 = por %p1876_p4, %p1875_p3 }
0x2033   :  { %p1878_p6 = pnand %p1877_p5, %p1871_p2 }
0x209f   :  { %v1479_v51 = vpop.permute.xlu0 %1478 }
0x20a3   :  { %v1483_v23 = vpop.permute.xlu0 %1482 }
0x20a4   :  { %v1488_v27 = vsel %vm1463_vm8, %v1479_v51, %v1483_v23 }
0x20a5   :  { %v1490_v26 = vsel %vm1489_vm15, %v1488_v27, %v1486_v57 }
0x20a6   :  { %1492 = vst.msk [vmem:[#allocation5] sm:$0x3] %vm1491_vm0, %v1490_v26 }
0x20a7   :  { %1881 = shalt.err (!%p1878_p6)
}
0x20a8   :  { %s1882_s23 = scalar_lea.hbm %s2462_s9, 32 }
0x20a9   :  { %p1883_p7 = scmp.ne.s32.totalorder %s2462_s9, %s1882_s23  ;;  %p1886_p8 = scmp.lt.u32.totalorder %s1882_s23, %s2462_s9 }
0x20ab   :  { %p1888_p9 = pnand %p1886_p8, %p1883_p7 }
0x20ad   :  { %1891 = shalt.err (!%p1888_p9)
}
0x20ae   :  { %1502 = dma.vmem_to_hbm [thread:$0]  %s1500_s21, 32, %s2462_s9, [#allocation4]  }
0x20af   :  { %1894 = dma.done.wait [#allocation4], 32  }
0x20b0   :  { %1895 = vsyncadd [#allocation4], 4294967264 }
0x20b1   :  { %1896 = dma.done.wait [#allocation7], 256  }
0x20b2   :  { %1897 = vsyncadd [#allocation7], 4294967040 }
0x20b3   :  { %1521 = vsyncpa [#allocation3], 1 }
0x20b4   :  { %1522 = vsyncpa [#allocation4], 1 }
0x20b5   :  { %1523 = vsyncpa [#allocation7], 1 }

</bundles_post_ra>
